<compile_context>
chip_gen: v6e
topology: v6e:2x2x1
jax: 0.10.0
libtpu: 0.0.40
codegen_flags: <defaults>
</compile_context>

<pallas_src>
import functools

import jax
import jax.numpy as jnp
from jax import lax
from jax.experimental import pallas as pl
from jax.experimental.pallas import tpu as pltpu


# --------------------------------------------------------------------------
# Kernel
# --------------------------------------------------------------------------
def _cross_cosine_kernel(x_ref, yt_ref, inv_xn_ref, inv_yn_ref, out_ref, *acc,
                         margin, pos_wt, neg_wt, single_k):
    i = pl.program_id(0)
    j = pl.program_id(1)

    def epilogue(dots):
        # dots: (T, T) f32 = <x[i_tile], y[j_tile]>
        inv_x = inv_xn_ref[...]            # (T, 1)  1/||x_row||  (0.0 on pad rows)
        inv_y = inv_yn_ref[...]            # (1, T)  1/||y_row||  (0.0 on pad cols)
        cos = dots * inv_x * inv_y         # (T, T)

        # Per-row margin: +LARGE on pad rows makes their hinge exactly 0 with
        # no separate (T, T) row-mask multiply.
        margin_row = jnp.where(inv_x > 0.0, jnp.float32(margin),
                               jnp.float32(3.0e38))               # (T, 1)
        neg = jnp.maximum(cos - margin_row, 0.0)                  # hinge (target = -1)

        # neg_wt folded with column validity (pad columns contribute 0).
        col_w = jnp.where(inv_y > 0.0, jnp.float32(neg_wt), 0.0)  # (1, T)
        part = jnp.sum(neg, axis=0, keepdims=True) * col_w        # (1, T)

        # Lane-dense, unmasked store: replicate across the 8 output sublanes
        # (divided back out by 1/8 in the wrapper).
        out_ref[...] = jnp.broadcast_to(part, out_ref.shape)

        # Diagonal tiles only: replace the hinge term with pos_wt * (1 - cos)
        # on valid diagonal entries (row tile size == col tile size == T).
        @pl.when(i == j)
        def _():
            tm, tn = cos.shape
            r = lax.broadcasted_iota(jnp.int32, (tm, tn), 0)
            c = lax.broadcasted_iota(jnp.int32, (tm, tn), 1)
            on_diag = jnp.logical_and(r == c, inv_x > 0.0)
            corr = jnp.where(on_diag, pos_wt * (1.0 - cos) - neg_wt * neg, 0.0)
            out_ref[...] += jnp.sum(corr, axis=0, keepdims=True)

    if single_k:
        # Full feature dim in one MXU contraction; no accumulator round-trip.
        dots = jnp.dot(x_ref[...], yt_ref[...],
                       preferred_element_type=jnp.float32)
        epilogue(dots)
    else:
        acc_ref, = acc
        k = pl.program_id(2)
        nk = pl.num_programs(2)

        @pl.when(k == 0)
        def _():
            acc_ref[...] = jnp.zeros_like(acc_ref)

        acc_ref[...] += jnp.dot(x_ref[...], yt_ref[...],
                                preferred_element_type=jnp.float32)

        @pl.when(k == nk - 1)
        def _():
            epilogue(acc_ref[...])


# --------------------------------------------------------------------------
# Wrapper helpers
# --------------------------------------------------------------------------
def _round_up(a, b):
    return -(-a // b) * b


def _largest_divisor_tile(padded, prefs):
    for t in prefs:
        if padded % t == 0:
            return t
    return prefs[-1]


def _vmem_capacity_bytes():
    try:
        cap = int(pltpu.get_tpu_info().vmem_capacity_bytes)
        if cap > 0:
            return cap
    except Exception:
        pass
    return 64 * 1024 * 1024   # conservative fallback: v7x per-TensorCore VMEM


def _select_tiles(n, d, itemsize, vmem_cap, max_feature_chunk=None):
    n_pad = _round_up(max(n, 1), 128)
    d_pad = _round_up(max(d, 1), 128)

    # Budget for the Pallas-managed working set (tiles + acc + epilogue temps).
    tile_budget = min(vmem_cap // 2, 72 * 1024 * 1024)

    t_prefs = (512, 384, 256, 128)
    if tile_budget >= 56 * 1024 * 1024 and itemsize <= 2:
        # 128-MiB-VMEM chips (v5e/v6e) with bf16 inputs: push past the
        # HBM/MXU ridge (~650 flop/B on v6e).
        t_prefs = (1024, 768, 512, 384, 256, 128)
    T = _largest_divisor_tile(n_pad, t_prefs)

    # Fixed VMEM cost: (T,T) f32 acc + ~3 (T,T) f32 epilogue temps
    # + out blocks + side inputs + slack.
    fixed = 4 * T * T * 4 + 4 * 8 * T * 4 + (4 << 20)
    avail = tile_budget - fixed
    per_128 = 4 * T * 128 * itemsize   # x + y^T tiles, double-buffered, per 128 of TK
    max_tk = max(avail // per_128, 1) * 128

    if d_pad <= max_tk:
        TK = d_pad                     # keep x resident across the whole j sweep
    else:
        TK = 128
        for cand in (4096, 2048, 1024, 512, 256):
            if cand <= max_tk and cand <= d_pad:
                TK = cand
                break
        d_pad = _round_up(d, TK)

    if max_feature_chunk is not None:  # testing hook: force k-tiling
        TK = min(TK, _round_up(max_feature_chunk, 128))
        d_pad = _round_up(d, TK)

    return n_pad, d_pad, T, TK


def _reference_loss(x, y, margin=0.0, pos_wt=1.0, neg_wt=1.0):
    """Pure-JAX reference mirroring the PyTorch module (reduction='mean')."""
    x = x.astype(jnp.float32)
    y = y.astype(jnp.float32)
    n = x.shape[0]
    dots = jnp.dot(x, y.T, precision=lax.Precision.HIGHEST)
    xn = jnp.linalg.norm(x, axis=-1, keepdims=True)
    yn = jnp.linalg.norm(y, axis=-1, keepdims=True)
    cos = dots / jnp.maximum(xn * yn.T, 1e-8)
    eye = jnp.eye(n, dtype=bool)
    loss = jnp.where(eye, 1.0 - cos, jnp.maximum(cos - margin, 0.0))
    w = jnp.where(eye, pos_wt, neg_wt)
    return jnp.sum(loss * w) / (n * n)


# --------------------------------------------------------------------------
# Public entry point
# --------------------------------------------------------------------------
def cross_cosine_embedding_loss(x, y, *, margin=0.0, pos_wt=1.0, neg_wt=1.0,
                                max_feature_chunk=None):
    """Pallas TPU implementation of CrossCosineEmbeddingLoss.forward
    (reduction='mean'). Returns {'loss': scalar} like the PyTorch module."""
    assert x.ndim == 2 and x.shape == y.shape, (x.shape, y.shape)
    n, d = x.shape

    # Tiny batches: a single-tile kernel over a zero-padded 128x128 problem is
    # dominated by padding/launch overhead, not math -> plain JAX.
    if n <= 64:
        return {"loss": _reference_loss(x, y, margin, pos_wt, neg_wt)}

    itemsize = jnp.dtype(x.dtype).itemsize
    vmem_cap = _vmem_capacity_bytes()
    n_pad, d_pad, T, TK = _select_tiles(n, d, itemsize, vmem_cap,
                                        max_feature_chunk)
    ni = n_pad // T
    nk = d_pad // TK
    single_k = (nk == 1)

    # ---- O(n*d) precompute in plain JAX, done once (not per tile) ----------
    xf = x.astype(jnp.float32)
    yf = y.astype(jnp.float32)
    # eps is applied per-norm here (vs. on the product in torch); identical
    # for any non-degenerate vectors.
    inv_xn = 1.0 / jnp.maximum(jnp.sqrt(jnp.sum(xf * xf, axis=-1)), 1e-8)
    inv_yn = 1.0 / jnp.maximum(jnp.sqrt(jnp.sum(yf * yf, axis=-1)), 1e-8)

    pn, pd = n_pad - n, d_pad - d
    x_p = jnp.pad(x, ((0, pn), (0, pd)))          # (n_pad, d_pad), native dtype
    yt_p = jnp.pad(y, ((0, pn), (0, pd))).T       # (d_pad, n_pad), pre-transposed
    # Zero padding of the inverse norms doubles as the row/col validity mask.
    inv_xn_p = jnp.pad(inv_xn, (0, pn)).reshape(n_pad, 1)
    inv_yn_p = jnp.pad(inv_yn, (0, pn)).reshape(1, n_pad)

    kernel = functools.partial(
        _cross_cosine_kernel,
        margin=float(margin), pos_wt=float(pos_wt), neg_wt=float(neg_wt),
        single_k=single_k)

    # ---- specs ------------------------------------------------------------
    if single_k:
        grid = (ni, ni)
        in_specs = [
            pl.BlockSpec((T, TK), lambda i, j: (i, 0)),   # x tile (resident over j)
            pl.BlockSpec((TK, T), lambda i, j: (0, j)),   # y^T tile
            pl.BlockSpec((T, 1), lambda i, j: (i, 0)),    # 1/||x|| column
            pl.BlockSpec((1, T), lambda i, j: (0, j)),    # 1/||y|| row
        ]
        out_spec = pl.BlockSpec((8, T), lambda i, j: (i, j))
        dim_sem = ("parallel", "parallel")
        scratch = []
    else:
        grid = (ni, ni, nk)
        in_specs = [
            pl.BlockSpec((T, TK), lambda i, j, k: (i, k)),
            pl.BlockSpec((TK, T), lambda i, j, k: (k, j)),
            pl.BlockSpec((T, 1), lambda i, j, k: (i, 0)),
            pl.BlockSpec((1, T), lambda i, j, k: (0, j)),
        ]
        out_spec = pl.BlockSpec((8, T), lambda i, j, k: (i, j))
        dim_sem = ("parallel", "parallel", "arbitrary")
        scratch = [pltpu.VMEM((T, T), jnp.float32)]

    # ---- cost estimate (resident-x traffic when nk == 1) -------------------
    if single_k:
        in_elems = (ni + 1) * n_pad * d_pad
    else:
        in_elems = 2 * ni * n_pad * d_pad
    cost = pl.CostEstimate(
        flops=2 * n_pad * n_pad * d_pad,
        transcendentals=0,
        bytes_accessed=in_elems * itemsize + ni * ni * 8 * T * 4 + 2 * n_pad * 4)

    vmem_limit = min(int(vmem_cap * 0.75), 100 * 1024 * 1024)

    out = pl.pallas_call(
        kernel,
        out_shape=jax.ShapeDtypeStruct((ni * 8, ni * T), jnp.float32),
        grid_spec=pltpu.PrefetchScalarGridSpec(
            num_scalar_prefetch=0,
            grid=grid,
            in_specs=in_specs,
            out_specs=out_spec,
            scratch_shapes=scratch,
        ),
        compiler_params=pltpu.CompilerParams(
            dimension_semantics=dim_sem,
            vmem_limit_bytes=vmem_limit,
        ),
        cost_estimate=cost,
    )(x_p, yt_p, inv_xn_p, inv_yn_p)

    # Each (i, j) block replicates its per-column partial sums across 8
    # sublanes (lane-dense unmasked stores), so divide by 8 (exact) and by
    # the true n^2.
    loss = jnp.sum(out) * 0.125 / (float(n) * float(n))
    # TODO(synk): reduction='dynamic' depends on a stateful host-side divisor
    # (10 ** floor(log10(first-batch loss))) and is not implemented here.
    return {"loss": loss}


# --------------------------------------------------------------------------
# Self test
# --------------------------------------------------------------------------
if __name__ == "__main__":
    key = jax.random.PRNGKey(0)
    k1, k2, k3, k4, k5, k6 = jax.random.split(key, 6)

    # Case 1: tiny embedding batch implied by the module's forward (n=8, d=32)
    # -> plain-JAX fast path.
    x1 = jax.random.normal(k1, (8, 32), dtype=jnp.float32)
    y1 = jax.random.normal(k2, (8, 32), dtype=jnp.float32)
    r1 = cross_cosine_embedding_loss(x1, y1)
    l1 = jax.block_until_ready(r1["loss"])
    ref1 = _reference_loss(x1, y1, 0.0, 1.0, 1.0)
    assert jnp.allclose(l1, ref1, atol=1e-4, rtol=1e-4), (l1, ref1)

    # Case 2: unaligned shape -> Pallas kernel with a multi-tile (5, 5) grid,
    # row/col/feature padding masks, negative margin, non-unit weights.
    x2 = jax.random.normal(k3, (520, 200), dtype=jnp.float32)
    y2 = jax.random.normal(k4, (520, 200), dtype=jnp.float32)
    r2 = cross_cosine_embedding_loss(x2, y2, margin=-0.1, pos_wt=2.0, neg_wt=0.5)
    l2 = jax.block_until_ready(r2["loss"])
    ref2 = _reference_loss(x2, y2, -0.1, 2.0, 0.5)
    assert jnp.allclose(l2, ref2, atol=1e-3, rtol=1e-3), (l2, ref2)

    # Case 3: bf16 inputs fed straight to the MXU (f32 accumulation).
    x3 = jax.random.normal(k5, (256, 512), dtype=jnp.bfloat16)
    y3 = jax.random.normal(k6, (256, 512), dtype=jnp.bfloat16)
    r3 = cross_cosine_embedding_loss(x3, y3, margin=0.1)
    l3 = jax.block_until_ready(r3["loss"])
    ref3 = _reference_loss(x3, y3, 0.1, 1.0, 1.0)
    assert jnp.allclose(l3, ref3, atol=2e-3, rtol=2e-2), (l3, ref3)

    # Case 4: force feature k-tiling (nk > 1) to exercise the accumulator path.
    r4 = cross_cosine_embedding_loss(x2, y2, margin=-0.1, pos_wt=2.0,
                                     neg_wt=0.5, max_feature_chunk=128)
    l4 = jax.block_until_ready(r4["loss"])
    assert jnp.allclose(l4, ref2, atol=1e-3, rtol=1e-3), (l4, ref2)

    print("KERNEL_OK")
</pallas_src>

<mosaic_0001>
module attributes {stable_mosaic.version = 11 : i64} {
  func.func @_cross_cosine_kernel(%arg0: i32, %arg1: i32, %arg2: memref<128x256xf32, #tpu.memory_space<vmem>>, %arg3: memref<256x128xf32, #tpu.memory_space<vmem>>, %arg4: memref<128x1xf32, #tpu.memory_space<vmem>>, %arg5: memref<1x128xf32, #tpu.memory_space<vmem>>, %arg6: memref<8x128xf32, #tpu.memory_space<vmem>>) attributes {dimension_semantics = [#tpu.dimension_semantics<parallel>, #tpu.dimension_semantics<parallel>], iteration_bounds = array<i64: 5, 5>, scalar_prefetch = 0 : i64, scratch_operands = 0 : i64, tpu.core_type = #tpu.core_type<tc>, window_params = [{transform_indices = @transform_0, window_bounds = array<i64: 128, 256>}, {transform_indices = @transform_1, window_bounds = array<i64: 256, 128>}, {transform_indices = @transform_2, window_bounds = array<i64: 128, 1>}, {transform_indices = @transform_3, window_bounds = array<i64: 1, 128>}, {transform_indices = @transform_4, window_bounds = array<i64: 8, 128>}]} {
    %c0 = arith.constant 0 : index
    %c0_0 = arith.constant 0 : index
    %0 = vector.load %arg2[%c0, %c0_0] : memref<128x256xf32, #tpu.memory_space<vmem>>, vector<128x256xf32>
    %c0_1 = arith.constant 0 : index
    %c0_2 = arith.constant 0 : index
    %1 = vector.load %arg3[%c0_1, %c0_2] : memref<256x128xf32, #tpu.memory_space<vmem>>, vector<256x128xf32>
    %cst = arith.constant dense<0.000000e+00> : vector<128x128xf32>
    %2 = tpu.matmul %0, %1, %cst {dimension_numbers = #tpu.dot_dimension_numbers<[1], [0], [0], [1], [0, 0, 1, 1], [], []>} : vector<128x256xf32>, vector<256x128xf32>, vector<128x128xf32> -> vector<128x128xf32>
    %c0_3 = arith.constant 0 : index
    %c0_4 = arith.constant 0 : index
    %3 = vector.load %arg4[%c0_3, %c0_4] : memref<128x1xf32, #tpu.memory_space<vmem>>, vector<128x1xf32>
    %c0_5 = arith.constant 0 : index
    %c0_6 = arith.constant 0 : index
    %4 = vector.load %arg5[%c0_5, %c0_6] : memref<1x128xf32, #tpu.memory_space<vmem>>, vector<1x128xf32>
    %5 = vector.broadcast %3 : vector<128x1xf32> to vector<128x128xf32>
    %6 = arith.mulf %2, %5 : vector<128x128xf32>
    %7 = vector.broadcast %4 : vector<1x128xf32> to vector<128x128xf32>
    %8 = arith.mulf %6, %7 : vector<128x128xf32>
    %cst_7 = arith.constant 0.000000e+00 : f32
    %9 = vector.broadcast %cst_7 : f32 to vector<128x1xf32>
    %10 = arith.cmpf ogt, %3, %9 : vector<128x1xf32>
    %cst_8 = arith.constant -1.000000e-01 : f32
    %cst_9 = arith.constant 3.000000e+38 : f32
    %11 = vector.broadcast %cst_8 : f32 to vector<128x1xf32>
    %12 = vector.broadcast %cst_9 : f32 to vector<128x1xf32>
    %13 = arith.select %10, %11, %12 : vector<128x1xi1>, vector<128x1xf32>
    %14 = vector.broadcast %13 : vector<128x1xf32> to vector<128x128xf32>
    %15 = arith.subf %8, %14 : vector<128x128xf32>
    %cst_10 = arith.constant 0.000000e+00 : f32
    %16 = vector.broadcast %cst_10 : f32 to vector<128x128xf32>
    %17 = arith.maximumf %15, %16 : vector<128x128xf32>
    %cst_11 = arith.constant 0.000000e+00 : f32
    %18 = vector.broadcast %cst_11 : f32 to vector<1x128xf32>
    %19 = arith.cmpf ogt, %4, %18 : vector<1x128xf32>
    %cst_12 = arith.constant 5.000000e-01 : f32
    %cst_13 = arith.constant 0.000000e+00 : f32
    %20 = vector.broadcast %cst_12 : f32 to vector<1x128xf32>
    %21 = vector.broadcast %cst_13 : f32 to vector<1x128xf32>
    %22 = arith.select %19, %20, %21 : vector<1x128xi1>, vector<1x128xf32>
    %cst_14 = arith.constant dense<0.000000e+00> : vector<128xf32>
    %23 = vector.multi_reduction <add>, %17, %cst_14 [0] : vector<128x128xf32> to vector<128xf32>
    %24 = vector.shape_cast %23 : vector<128xf32> to vector<1x128xf32>
    %25 = arith.mulf %24, %22 : vector<1x128xf32>
    %26 = vector.shape_cast %25 : vector<1x128xf32> to vector<1x128xf32>
    %27 = vector.broadcast %26 : vector<1x128xf32> to vector<8x128xf32>
    %c0_15 = arith.constant 0 : index
    %c0_16 = arith.constant 0 : index
    %28 = vector.load %arg6[%c0_15, %c0_16] : memref<8x128xf32, #tpu.memory_space<vmem>>, vector<8x128xf32>
    tpu.vector_store %arg6[%c0_15, %c0_16], %27 {strides = array<i32>} : memref<8x128xf32, #tpu.memory_space<vmem>>, vector<8x128xf32>,
    %29 = arith.cmpi eq, %arg0, %arg1 : i32
    %30 = arith.extui %29 : i1 to i32
    %c0_i32 = arith.constant 0 : i32
    %31 = arith.cmpi ne, %30, %c0_i32 : i32
    scf.if %31 {
      %32 = tpu.iota {dimensions = array<i32: 0>} : vector<128x128xi32>
      %33 = tpu.iota {dimensions = array<i32: 1>} : vector<128x128xi32>
      %34 = arith.cmpi eq, %32, %33 : vector<128x128xi32>
      %cst_17 = arith.constant 0.000000e+00 : f32
      %35 = vector.broadcast %cst_17 : f32 to vector<128x1xf32>
      %36 = arith.cmpf ogt, %3, %35 : vector<128x1xf32>
      %37 = vector.broadcast %36 : vector<128x1xi1> to vector<128x128xi1>
      %38 = arith.andi %34, %37 : vector<128x128xi1>
      %cst_18 = arith.constant 1.000000e+00 : f32
      %39 = vector.broadcast %cst_18 : f32 to vector<128x128xf32>
      %40 = arith.subf %39, %8 : vector<128x128xf32>
      %cst_19 = arith.constant 2.000000e+00 : f32
      %41 = vector.broadcast %cst_19 : f32 to vector<128x128xf32>
      %42 = arith.mulf %41, %40 : vector<128x128xf32>
      %cst_20 = arith.constant 5.000000e-01 : f32
      %43 = vector.broadcast %cst_20 : f32 to vector<128x128xf32>
      %44 = arith.mulf %43, %17 : vector<128x128xf32>
      %45 = arith.subf %42, %44 : vector<128x128xf32>
      %cst_21 = arith.constant 0.000000e+00 : f32
      %46 = vector.broadcast %cst_21 : f32 to vector<128x128xf32>
      %47 = arith.select %38, %45, %46 : vector<128x128xi1>, vector<128x128xf32>
      %c0_22 = arith.constant 0 : index
      %c0_23 = arith.constant 0 : index
      %48 = vector.load %arg6[%c0_22, %c0_23] : memref<8x128xf32, #tpu.memory_space<vmem>>, vector<8x128xf32>
      %cst_24 = arith.constant dense<0.000000e+00> : vector<128xf32>
      %49 = vector.multi_reduction <add>, %47, %cst_24 [0] : vector<128x128xf32> to vector<128xf32>
      %50 = vector.shape_cast %49 : vector<128xf32> to vector<1x128xf32>
      %51 = vector.broadcast %50 : vector<1x128xf32> to vector<8x128xf32>
      %52 = arith.addf %48, %51 : vector<8x128xf32>
      %c0_25 = arith.constant 0 : index
      %c0_26 = arith.constant 0 : index
      %53 = vector.load %arg6[%c0_25, %c0_26] : memref<8x128xf32, #tpu.memory_space<vmem>>, vector<8x128xf32>
      tpu.vector_store %arg6[%c0_25, %c0_26], %52 {strides = array<i32>} : memref<8x128xf32, #tpu.memory_space<vmem>>, vector<8x128xf32>,
    } else {
    }
    return
  }
  func.func @transform_0(%arg0: i32, %arg1: i32) -> (i32, i32) {
    %c0_i32 = arith.constant 0 : i32
    %c0_i32_0 = arith.constant 0 : i32
    return %arg0, %c0_i32 : i32, i32
  }
  func.func @transform_1(%arg0: i32, %arg1: i32) -> (i32, i32) {
    %c0_i32 = arith.constant 0 : i32
    %c0_i32_0 = arith.constant 0 : i32
    return %c0_i32, %arg1 : i32, i32
  }
  func.func @transform_2(%arg0: i32, %arg1: i32) -> (i32, i32) {
    %c0_i32 = arith.constant 0 : i32
    %c0_i32_0 = arith.constant 0 : i32
    return %arg0, %c0_i32 : i32, i32
  }
  func.func @transform_3(%arg0: i32, %arg1: i32) -> (i32, i32) {
    %c0_i32 = arith.constant 0 : i32
    %c0_i32_0 = arith.constant 0 : i32
    return %c0_i32, %arg1 : i32, i32
  }
  func.func @transform_4(%arg0: i32, %arg1: i32) -> (i32, i32) {
    %c0_i32 = arith.constant 0 : i32
    return %arg0, %arg1 : i32, i32
  }
}

</mosaic_0001>

<bundles_post_ra>
// kernel: tpu_custom_call.1
= control target key start
LH: loop header
LB: loop body
LE: loop exit
PB: predicated region body
PF: predicated region fallthrough
CT: control target
= control target key end

     0   :  { %s2542_s0 = inlined_call_operand.hbm [shape: f32[640,256], index: 0, kind: input, shape index: {}]   ;;  %s2543_s1 = inlined_call_operand.hbm [shape: f32[256,640], index: 1, kind: input, shape index: {}]   ;;  %s2544_s2 = inlined_call_operand.vmem [shape: f32[640,1], index: 2, kind: input, shape index: {}]   ;;  %s2545_s3 = inlined_call_operand.vmem [shape: f32[1,640], index: 3, kind: input, shape index: {}]   ;;  %s2546_s4 = inlined_call_operand.hbm [shape: f32[40,640], index: 4, kind: output, shape index: {}]  }
   0x1   :  { %2562 = sst [smem:[#allocation21_spill]] %s2542_s0 }
   0x2   :  { %2563 = sst [smem:[#allocation22_spill]] %s2544_s2 }
   0x3   :  { %2564 = sst [smem:[#allocation23_spill]] %s2545_s3 }
   0x4   :  { %2565 = sst [smem:[#allocation24_spill]] %s2546_s4 }
   0x5   :  { %9 = vsyncpa [#allocation3], 0 }
   0x6   :  { %11 = vsyncpa [#allocation3 + $0x1], 0 }
   0x7   :  { %12 = vsyncpa [#allocation6], 0 }
   0x8   :  { %14 = vsyncpa [#allocation6 + $0x1], 0 }
   0x9   :  { %15 = vsyncpa [#allocation4], 0 }
   0xa   :  { %17 = vsyncpa [#allocation4 + $0x1], 0  ;;  %s1729_s15 = smov 0   ;;  %s1731_s16 = smov 0  }
   0xb   :  { %s1733_s17 = smov 0   ;;  %s1735_s18 = smov 0  }
   0xc   :  { %s1737_s19 = smov 0   ;;  %s1739_s20 = smov 0  }
   0xd   :  { %s1741_s21 = smov 0   ;;  %s1743_s22 = smov 0  }
   0xe   :  { %s1745_s23 = smov 0   ;;  %s1747_s24 = smov 0  }
   0xf   :  { %s1749_s25 = smov 0   ;;  %s1751_s26 = smov 0  }
  0x10   :  { %s1753_s27 = smov 0   ;;  %s1755_s28 = smov 0  }
  0x11 LB: > { %2566 = sst [smem:[#allocation11_spill]] %s1674_s24  ;;  %s1206_s29 = sadd.s32 4294967295, %s1690_s28   ;;  %s1690_s28 = sphi %s1755_s28, %s23_s28   ;;  %s1686_s27 = sphi %s1753_s27, %s2610_s27   ;;  %s1682_s26 = sphi %s1751_s26, %s2621_s26   ;;  %s1678_s25 = sphi %s1749_s25, %s2608_s25   ;;  %s1674_s24 = sphi %s1747_s24, %s2620_s24   ;;  %s1670_s23 = sphi %s1745_s23, %s2619_s23   ;;  %s1666_s22 = sphi %s1743_s22, %s2618_s22   ;;  %s1662_s21 = sphi %s1741_s21, %s2617_s21   ;;  %s1658_s20 = sphi %s1739_s20, %s2616_s20   ;;  %s1654_s19 = sphi %s1737_s19, %s2615_s19   ;;  %s1650_s18 = sphi %s1735_s18, %s2614_s18   ;;  %s1646_s17 = sphi %s1733_s17, %s2613_s17   ;;  %s1642_s16 = sphi %s1731_s16, %s2612_s16   ;;  %s1638_s15 = sphi %s1729_s15, %s2611_s15  }
  0x12   : > { %2567 = sst [smem:[#allocation12_spill]] %s1686_s27  ;;  %p49_p0 = scmp.ne.s32.totalorder %s1670_s23, %s1666_s22 }
  0x13   : > { %p50_p1 = scmp.eq.s32.totalorder %s1690_s28, 0  ;;  %p55_p2 = scmp.ne.s32.totalorder %s1666_s22, %s1662_s21 }
  0x14   : > { %p1804_p3 = scmp.eq.s32.totalorder %s1206_s29, 0  ;;  %p1808_p4 = scmp.eq.s32.totalorder %s1206_s29, 24 }
  0x15   : > { %p51_p5 = por %p50_p1, %p49_p0  ;;  %p1359_p7 = scmp.lt.s32.totalorder %s1690_s28, 25 }
  0x16   : > { %p1816_p6 = por %p1804_p3, %p55_p2  ;;  %s185_s9 = sand.u32 1, %s1670_s23  }
  0x17   : > { %s1228_s10 = sshll.u32 %s1686_s27, 12  ;;  %s1210_s11 = sshll.u32 %s185_s9, 8 }
  0x18   : > { %s2571_s0 = sld [smem:[#allocation21_spill]]  ;;  %s189_s21 = scalar_lea.vmem [#allocation2], %s1210_s11 }
  0x19   : > { %s197_s29 = sshll.u32 %s189_s21, 4  ;;  %p1828_p8 = pnand %p1359_p7, %p51_p5  ;;  %s198_s29 = int_to_ptr.vmem [resolvable:$true] %s197_s29 }
  0x1a   : > { %s186_s30 = scalar_lea.sflag [#allocation3], %s185_s9  ;;  %s1499_s4 = scalar_lea.vmem %s198_s29, 4096 }
  0x1b   : > { %p1488_p9 = pneg %p1828_p8  ;;  %p1500_p10 = scmp.ne.s32.totalorder %s198_s29, %s1499_s4 }
  0x1c   : > { %s1692_s3 = smov [#allocation2]  }
  0x1d   : > { %p1502_p11 = pnand %p1500_p10, %p1488_p9  ;;  %s1504_s24 = sshll.u32 %s1692_s3, 4  ;;  %s1505_s24 = int_to_ptr.vmem [resolvable:$false] %s1504_s24 }
  0x1e   : > { %s196_s14 = scalar_lea.hbm %s2571_s0, %s1228_s10  ;;  %s1506_s10 = scalar_lea.vmem %s1505_s24, 8192 }
  0x1f   : > { %p1503_p12 = pneg %p1502_p11  ;;  %p1507_p13 = scmp.lt.s32.totalorder %s198_s29, %s1505_s24 }
  0x20   : > { %p1508_p0 = scmp.lt.s32.totalorder %s1506_s10, %s1499_s4 }
  0x22   : > { %p1509_p2 = por %p1508_p0, %p1507_p13 }
  0x24   : > { %p1510_p5 = pnand %p1509_p2, %p1503_p12 }
  0x26   : > { %1513 = shalt.err (!%p1510_p5)
}
  0x27   : > { %s1693_s11 = smov 256   ;;  %s1694_s3 = smov 16  }
  0x28   : > { %1351 = dma.hbm_to_vmem [thread:$0]  (!%p1828_p8), %s196_s14, 4096, %s198_s29, %s186_s30, %s1693_s11, %s1693_s11, %s1694_s3  }
  0x29   : > { %p1216_p9 = scmp.ge.s32.totalorder %s1690_s28, 1  ;;  %p240_p10 = scmp.lt.s32.totalorder %s1690_s28, 26 }
  0x2a   : > { %s1207_s24 = sadd.s32 4294967294, %s1690_s28   ;;  %s32_s9 = sadd.s32 1, %s1682_s26 }
  0x2b   : > { %p1838_p11 = pnand %p1216_p9, %p240_p10  ;;  %s68_s12 = sadd.s32 1, %s1658_s20 }
  0x2c   : > { %p33_p12 = scmp.ge.s32.totalorder %s32_s9, 5  ;;  %p75_p13 = scmp.ne.s32.totalorder %s1658_s20, %s1654_s19 }
  0x2d   : > { %p81_p0 = scmp.ne.s32.totalorder %s1654_s19, %s1650_s18  ;;  %s148_s5 = sadd.s32 1, %s1646_s17 }
  0x2e   : > { %s2623_s9 = smov (%p33_p12, %s32_s9), 0  ;;  %s2575_s30 = sadd.s32 1, %s1686_s27 }
  0x2f   : > { %2574 = sst [smem:[#allocation13_spill]] %s2623_s9  ;;  %s2625_s30 = smov (!%p33_p12, %s2575_s30), %s1686_s27 }
  0x30   : > { %s65_s13 = ssub.s32 %s1682_s26, %s2623_s9  ;;  %p1859_p8 = por %p75_p13, %p50_p1 }
  0x31   : > { %p37_p2 = scmp.ge.s32.totalorder %s2625_s30, 5  ;;  %p66_p5 = scmp.eq.s32.totalorder %s65_s13, 0 }
  0x32   : > { %p1865_p9 = por %p81_p0, %p1804_p3  ;;  %p158_p10 = scmp.ne.s32.totalorder %s1646_s17, %s1642_s16 }
  0x33   : > { %s2627_s30 = smov (%p37_p2, %s2625_s30), 0  ;;  %p164_p13 = scmp.ne.s32.totalorder %s1642_s16, %s1638_s15 }
  0x34   : > { %2578 = sst [smem:[#allocation14_spill]] %s2627_s30  ;;  %s39_s29 = ssub.s32 %s1686_s27, %s2627_s30 }
  0x35   : > { %s1874_s21 = scalar_select %p66_p5, %s1658_s20, %s68_s12  }
  0x36   : > { %p1880_p1 = por %p1808_p4, %p158_p10  ;;  %p40_p12 = scmp.eq.s32.totalorder %s39_s29, 0 }
  0x37   : > { %2579 = sst [smem:[#allocation15_spill]] %s1874_s21  ;;  %s145_s6 = sor.u32 %s65_s13, %s39_s29 }
  0x38   : > { %s2580_s10 = scalar_select %p1880_p1, 1, 0 }
  0x39   : > { %p146_p3 = scmp.eq.s32.totalorder %s145_s6, 0  ;;  %s2582_s11 = sadd.s32 1, %s1670_s23 }
  0x3a   : > { %2581 = sst [smem:[#allocation16_spill]] %s2580_s10  ;;  %p165_p0 = scmp.eq.s32.totalorder %s1207_s24, 24 }
  0x3b   : > { %s1889_s3 = scalar_select %p40_p12, %s1670_s23, %s2582_s11  }
  0x3c   : > { %s1892_s0 = scalar_select %p146_p3, %s1646_s17, %s148_s5  }
  0x3d   : > { %s207_s12 = sand.u32 1, %s1658_s20   ;;  %p1895_p2 = por %p165_p0, %p164_p13 }
  0x3e   : > { %s1214_s9 = sshll.u32 %s207_s12, 8  ;;  %s1215_s30 = sshll.u32 %s1682_s26, 7 }
  0x3f   : > { %s2583_s7 = scalar_select %p1895_p2, 1, 0 }
  0x40   : > { %s211_s27 = scalar_lea.vmem [#allocation5], %s1214_s9  ;;  %s216_s13 = scalar_lea.hbm %s2543_s1, %s1215_s30 }
  0x41   : > { %s217_s21 = sshll.u32 %s211_s27, 4  ;;  %p1907_p4 = pnand %p1359_p7, %p1859_p8  ;;  %s218_s21 = int_to_ptr.vmem [resolvable:$true] %s217_s21 }
  0x42   : > { %s208_s24 = scalar_lea.sflag [#allocation6], %s207_s12  ;;  %s1527_s29 = scalar_lea.vmem %s218_s21, 4096 }
  0x43   : > { %p1516_p5 = pneg %p1907_p4  ;;  %p1528_p10 = scmp.ne.s32.totalorder %s218_s21, %s1527_s29 }
  0x44   : > { %s1695_s27 = smov [#allocation5]  }
  0x45   : > { %p1530_p12 = pnand %p1528_p10, %p1516_p5  ;;  %s1532_s9 = sshll.u32 %s1695_s27, 4  ;;  %s1533_s9 = int_to_ptr.vmem [resolvable:$false] %s1532_s9 }
  0x46   : > { %s1534_s2 = scalar_lea.vmem %s1533_s9, 8192  ;;  %p1535_p13 = scmp.lt.s32.totalorder %s218_s21, %s1533_s9 }
  0x47   : > { %p1531_p3 = pneg %p1530_p12  ;;  %p1536_p0 = scmp.lt.s32.totalorder %s1534_s2, %s1527_s29 }
  0x49   : > { %p1537_p2 = por %p1536_p0, %p1535_p13 }
  0x4b   : > { %p1538_p1 = pnand %p1537_p2, %p1531_p3 }
  0x4d   : > { %1541 = shalt.err (!%p1538_p1)
}
  0x4e   : > { %s1696_s30 = smov 640   ;;  %s1697_s14 = smov 128  }
  0x4f   : > { %s1698_s10 = smov 8   ;;  %244 = sbr.rel (%p1838_p11) target bundleno = 600 (0x258), region = 36 }
  0x50   : > { %1354 = dma.hbm_to_vmem [thread:$0]  (!%p1907_p4), %s216_s13, 4096, %s218_s21, %s208_s24, %s1696_s30, %s1697_s14, %s1698_s10  }
  0x54   : > { %s246_s6 = sand.u32 1, %s1666_s22  }
  0x55   : > { %s1217_s11 = sshll.u32 %s246_s6, 8  ;;  %s247_s12 = scalar_lea.sflag [#allocation3], %s246_s6 }
  0x56   : > { %s1918_s27 = scalar_lea.vmem [#allocation2], %s1217_s11 }
  0x57   : > { %1625 = dma.done.wait (%p1816_p6), %s247_s12, 4096  }
  0x58   : > { %1627 = vsyncadd (%p1816_p6), %s247_s12, 4294963200  ;;  %s255_s29 = sand.u32 1, %s1654_s19  }
  0x59   : > { %s1218_s5 = sshll.u32 %s255_s29, 8  ;;  %s256_s21 = scalar_lea.sflag [#allocation6], %s255_s29 }
  0x5a   : > { %s1925_s13 = scalar_lea.vmem [#allocation5], %s1218_s5 }
  0x5b   : > { %1629 = dma.done.wait (%p1865_p9), %s256_s21, 4096  }
  0x5c   : > { %1631 = vsyncadd (%p1865_p9), %s256_s21, 4294963200  ;;  %v1699_v0 = vmov 0   ;;  %v370_v1 = vld [vmem:[%s1925_s13 + $0xf8] sm:$0xff]  ;;  %v369_v3 = vld [vmem:[%s1925_s13 + $0xf0] sm:$0xff]  ;;  %s1220_s8 = sshll.u32 %s1678_s25, 4  ;;  %s2585_s9 = sld [smem:[#allocation22_spill]] }
  0x5d   : > { %1482 = vset.pattern.permute.xlu0 %v1699_v0  ;;  %1483 = vset.pattern.permute.xlu1 %v1699_v0  ;;  %v354_v2 = vld [vmem:[%s1925_s13 + $0x78] sm:$0xff]  ;;  %v353_v4 = vld [vmem:[%s1925_s13 + $0x70] sm:$0xff]  ;;  %v368_v5 = vld [vmem:[%s1925_s13 + $0xe8] sm:$0xff]  ;;  %p299_p6 = scmp.lt.s32.totalorder %s1220_s8, 79  ;;  %v1700_v45 = vmov 3e+38  }
  0x5e   : > { %1229 = vmatprep.subr.mxu0 %v370_v1  ;;  %1309 = vmatprep.subr.mxu1 %v370_v1  ;;  %v352_v6 = vld [vmem:[%s1925_s13 + $0x68] sm:$0xff]  ;;  %v367_v7 = vld [vmem:[%s1925_s13 + $0xe0] sm:$0xff]  ;;  %v366_v9 = vld [vmem:[%s1925_s13 + $0xd8] sm:$0xff]  ;;  %s2587_s30 = sld [smem:[#allocation11_spill]] }
  0x5f   : > { %1230 = vmatpush3.msra.mxu0 %v354_v2  ;;  %1325 = vmatpush3.msra.mxu1 %v354_v2  ;;  %v351_v8 = vld [vmem:[%s1925_s13 + $0x60] sm:$0xff]  ;;  %v350_v10 = vld [vmem:[%s1925_s13 + $0x58] sm:$0xff]  ;;  %v365_v11 = vld [vmem:[%s1925_s13 + $0xd0] sm:$0xff]  ;;  %s2629_s8 = smov (!%p299_p6, %s1220_s8), 79  ;;  %s2588_s11 = sld [smem:[#allocation23_spill]] }
  0x60   : > { %1231 = vmatprep.subr.mxu0 %v369_v3  ;;  %1310 = vmatprep.subr.mxu1 %v369_v3  ;;  %v349_v12 = vld [vmem:[%s1925_s13 + $0x50] sm:$0xff]  ;;  %v364_v13 = vld [vmem:[%s1925_s13 + $0xc8] sm:$0xff]  ;;  %v363_v15 = vld [vmem:[%s1925_s13 + $0xc0] sm:$0xff]  ;;  %s1221_s4 = sshll.u32 %s2629_s8, 3 }
  0x61   : > { %1232 = vmatpush3.msra.mxu0 %v353_v4  ;;  %1326 = vmatpush3.msra.mxu1 %v353_v4  ;;  %v348_v14 = vld [vmem:[%s1925_s13 + $0x48] sm:$0xff]  ;;  %v347_v16 = vld [vmem:[%s1925_s13 + $0x40] sm:$0xff]  ;;  %v362_v17 = vld [vmem:[%s1925_s13 + $0xb8] sm:$0xff] }
  0x62   : > { %1233 = vmatprep.subr.mxu0 %v368_v5  ;;  %1311 = vmatprep.subr.mxu1 %v368_v5  ;;  %v346_v18 = vld [vmem:[%s1925_s13 + $0x38] sm:$0xff]  ;;  %v361_v19 = vld [vmem:[%s1925_s13 + $0xb0] sm:$0xff]  ;;  %v360_v21 = vld [vmem:[%s1925_s13 + $0xa8] sm:$0xff]  ;;  %s1964_s2 = scalar_lea.vmem %s2585_s9, %s1221_s4 }
  0x63   : > { %1234 = vmatpush3.msra.mxu0 %v352_v6  ;;  %1327 = vmatpush3.msra.mxu1 %v352_v6  ;;  %v345_v20 = vld [vmem:[%s1925_s13 + $0x30] sm:$0xff]  ;;  %v344_v22 = vld [vmem:[%s1925_s13 + $0x28] sm:$0xff]  ;;  %v359_v23 = vld [vmem:[%s1925_s13 + $0xa0] sm:$0xff] }
  0x64   : > { %1235 = vmatprep.subr.mxu0 %v367_v7  ;;  %1312 = vmatprep.subr.mxu1 %v367_v7  ;;  %v343_v24 = vld [vmem:[%s1925_s13 + $0x20] sm:$0xff]  ;;  %v358_v25 = vld [vmem:[%s1925_s13 + $0x98] sm:$0xff]  ;;  %v357_v27 = vld [vmem:[%s1925_s13 + $0x90] sm:$0xff]  ;;  %p304_p7 = scmp.lt.s32.totalorder %s2587_s30, 4  ;;  %p1222_p11 = scmp.ne.s32.totalorder %s1678_s25, %s2587_s30 }
  0x65   : > { %1236 = vmatpush3.msra.mxu0 %v351_v8  ;;  %1328 = vmatpush3.msra.mxu1 %v351_v8  ;;  %v342_v26 = vld [vmem:[%s1925_s13 + $0x18] sm:$0xff]  ;;  %v341_v28 = vld [vmem:[%s1925_s13 + $0x10] sm:$0xff]  ;;  %v356_v29 = vld [vmem:[%s1925_s13 + $0x88] sm:$0xff] }
  0x66   : > { %1237 = vmatprep.subr.mxu0 %v366_v9  ;;  %1313 = vmatprep.subr.mxu1 %v366_v9  ;;  %v340_v30 = vld [vmem:[%s1925_s13 + $0x8] sm:$0xff]  ;;  %v355_v31 = vld [vmem:[%s1925_s13 + $0x80] sm:$0xff]  ;;  %v1978_v38 = vld [vmem:[%s1964_s2 + $0x10] sm:$0xff]  ;;  %s305_s14 = scalar_select %p304_p7, %s2587_s30, 4 }
  0x67   : > { %1238 = vmatpush3.msra.mxu0 %v350_v10  ;;  %1329 = vmatpush3.msra.mxu1 %v350_v10  ;;  %v1969_v32 = vld [vmem:[%s1964_s2] sm:$0xff]  ;;  %v308_v34 = vld [vmem:[%s1918_s27 + $0x8] sm:$0xff]  ;;  %v310_v40 = vld [vmem:[%s1918_s27 + $0x18] sm:$0xff]  ;;  %vm653_vm2 = vcmp.gt.f32.partialorder %v1978_v38, 0.0 }
  0x68   : > { %1239 = vmatprep.subr.mxu0 %v365_v11  ;;  %1314 = vmatprep.subr.mxu1 %v365_v11  ;;  %v339_v33 = vld [vmem:[%s1925_s13] sm:$0xff]  ;;  %v324_v35 = vld [vmem:[%s1918_s27 + $0x88] sm:$0xff]  ;;  %vm651_vm0 = vcmp.gt.f32.partialorder %v1969_v32, 0.0  ;;  %v326_v41 = vld [vmem:[%s1918_s27 + $0x98] sm:$0xff]  ;;  %v669_v57 = vsel %vm653_vm2, -0.1, %v1700_v45  ;;  %s306_s12 = scalar_lea.vmem %s2588_s11, %s305_s14 }
  0x69   : > { %1240 = vmatpush3.msra.mxu0 %v349_v12  ;;  %1330 = vmatpush3.msra.mxu1 %v349_v12  ;;  %v307_v36 = vld [vmem:[%s1918_s27] sm:$0xff]  ;;  %v1981_v39 = vld [vmem:[%s1964_s2 + $0x8] sm:$0xff]  ;;  %v309_v42 = vld [vmem:[%s1918_s27 + $0x10] sm:$0xff]  ;;  %v667_v46 = vsel %vm651_vm0, -0.1, %v1700_v45 }
  0x6a   : > { %1241 = vmatprep.subr.mxu0 %v364_v13  ;;  %1315 = vmatprep.subr.mxu1 %v364_v13  ;;  %v323_v37 = vld [vmem:[%s1918_s27 + $0x80] sm:$0xff]  ;;  %v325_v43 = vld [vmem:[%s1918_s27 + $0x90] sm:$0xff]  ;;  %v1991_v44 = vld [vmem:[%s1964_s2 + $0x18] sm:$0xff]  ;;  %vm652_vm1 = vcmp.gt.f32.partialorder %v1981_v39, 0.0 }
  0x6b   : > { %1242 = vmatpush3.msra.mxu0 %v348_v14  ;;  %1331 = vmatpush3.msra.mxu1 %v348_v14  ;;  %v312_v47 = vld [vmem:[%s1918_s27 + $0x28] sm:$0xff]  ;;  %v311_v49 = vld [vmem:[%s1918_s27 + $0x20] sm:$0xff]  ;;  %v668_v51 = vsel %vm652_vm1, -0.1, %v1700_v45  ;;  %v314_v53 = vld [vmem:[%s1918_s27 + $0x38] sm:$0xff]  ;;  %vm654_vm3 = vcmp.gt.f32.partialorder %v1991_v44, 0.0 }
  0x6c   : > { %1243 = vmatprep.subr.mxu0 %v363_v15  ;;  %1316 = vmatprep.subr.mxu1 %v363_v15  ;;  %v328_v48 = vld [vmem:[%s1918_s27 + $0xa8] sm:$0xff]  ;;  %v327_v50 = vld [vmem:[%s1918_s27 + $0xa0] sm:$0xff]  ;;  %v330_v54 = vld [vmem:[%s1918_s27 + $0xb8] sm:$0xff]  ;;  %v670_v63 = vsel %vm654_vm3, -0.1, %v1700_v45 }
  0x6d   : > { %1244 = vmatpush3.msra.mxu0 %v347_v16  ;;  %1332 = vmatpush3.msra.mxu1 %v347_v16  ;;  %v2007_v52 = vld [vmem:[%s1964_s2 + $0x20] sm:$0xff]  ;;  %v313_v55 = vld [vmem:[%s1918_s27 + $0x30] sm:$0xff]  ;;  %v2018_v58 = vld [vmem:[%s1964_s2 + $0x28] sm:$0xff] }
  0x6e   : > { %1245 = vmatprep.subr.mxu0 %v362_v17  ;;  %1317 = vmatprep.subr.mxu1 %v362_v17  ;;  %v329_v56 = vld [vmem:[%s1918_s27 + $0xb0] sm:$0xff]  ;;  %v316_v59 = vld [vmem:[%s1918_s27 + $0x48] sm:$0xff]  ;;  %v315_v61 = vld [vmem:[%s1918_s27 + $0x40] sm:$0xff]  ;;  %vm655_vm4 = vcmp.gt.f32.partialorder %v2007_v52, 0.0  ;;  %vm656_vm5 = vcmp.gt.f32.partialorder %v2018_v58, 0.0 }
  0x6f   : > { %1246 = vmatpush3.msra.mxu0 %v346_v18  ;;  %1333 = vmatpush3.msra.mxu1 %v346_v18  ;;  %v332_v60 = vld [vmem:[%s1918_s27 + $0xc8] sm:$0xff]  ;;  %v331_v62 = vld [vmem:[%s1918_s27 + $0xc0] sm:$0xff]  ;;  %v2030_v0 = vld [vmem:[%s1964_s2 + $0x30] sm:$0xff]  ;;  %v671_v5 = vsel %vm655_vm4, -0.1, %v1700_v45 }
  0x70   : > { %1247 = vmatprep.subr.mxu0 %v361_v19  ;;  %1318 = vmatprep.subr.mxu1 %v361_v19  ;;  %v318_v1 = vld [vmem:[%s1918_s27 + $0x58] sm:$0xff]  ;;  %v317_v3 = vld [vmem:[%s1918_s27 + $0x50] sm:$0xff]  ;;  %v320_v7 = vld [vmem:[%s1918_s27 + $0x68] sm:$0xff]  ;;  %v672_v11 = vsel %vm656_vm5, -0.1, %v1700_v45  ;;  %vm657_vm6 = vcmp.gt.f32.partialorder %v2030_v0, 0.0 }
  0x71   : > { %1248 = vmatpush3.msra.mxu0 %v345_v20  ;;  %1334 = vmatpush3.msra.mxu1 %v345_v20  ;;  %v334_v2 = vld [vmem:[%s1918_s27 + $0xd8] sm:$0xff]  ;;  %v333_v4 = vld [vmem:[%s1918_s27 + $0xd0] sm:$0xff]  ;;  %v336_v8 = vld [vmem:[%s1918_s27 + $0xe8] sm:$0xff]  ;;  %v673_v17 = vsel %vm657_vm6, -0.1, %v1700_v45 }
  0x72   : > { %1249 = vmatprep.subr.mxu0 %v360_v21  ;;  %1319 = vmatprep.subr.mxu1 %v360_v21  ;;  %v2042_v6 = vld [vmem:[%s1964_s2 + $0x38] sm:$0xff]  ;;  %v319_v9 = vld [vmem:[%s1918_s27 + $0x60] sm:$0xff]  ;;  %v321_v15 = vld [vmem:[%s1918_s27 + $0x70] sm:$0xff] }
  0x73   : > { %1250 = vmatpush3.msra.mxu0 %v344_v22  ;;  %1335 = vmatpush3.msra.mxu1 %v344_v22  ;;  %v335_v10 = vld [vmem:[%s1918_s27 + $0xe0] sm:$0xff]  ;;  %v322_v13 = vld [vmem:[%s1918_s27 + $0x78] sm:$0xff]  ;;  %v337_v16 = vld [vmem:[%s1918_s27 + $0xf0] sm:$0xff]  ;;  %vm658_vm7 = vcmp.gt.f32.partialorder %v2042_v6, 0.0 }
  0x74   : > { %1251 = vmatprep.subr.mxu0 %v359_v23  ;;  %1320 = vmatprep.subr.mxu1 %v359_v23  ;;  %v2054_v12 = vld [vmem:[%s1964_s2 + $0x40] sm:$0xff]  ;;  %v338_v14 = vld [vmem:[%s1918_s27 + $0xf8] sm:$0xff]  ;;  %v2066_v18 = vld [vmem:[%s1964_s2 + $0x48] sm:$0xff]  ;;  %v674_v19 = vsel %vm658_vm7, -0.1, %v1700_v45  ;;  %s294_s27 = sand.u32 1, %s1642_s16  }
  0x75   : > { %1252 = vmatpush3.msra.mxu0 %v343_v24  ;;  %1336 = vmatpush3.msra.mxu1 %v343_v24  ;;  %v2074_v20 = vld [vmem:[%s1964_s2 + $0x50] sm:$0xff]  ;;  %vm659_vm8 = vcmp.gt.f32.partialorder %v2054_v12, 0.0  ;;  %v2082_v22 = vld [vmem:[%s1964_s2 + $0x58] sm:$0xff]  ;;  %vm660_vm9 = vcmp.gt.f32.partialorder %v2066_v18, 0.0  ;;  %v2090_v24 = vld [vmem:[%s1964_s2 + $0x60] sm:$0xff]  ;;  %s1219_s29 = sshll.u32 %s294_s27, 3 }
  0x76   : > { %1253 = vmatprep.subr.mxu0 %v358_v25  ;;  %1321 = vmatprep.subr.mxu1 %v358_v25  ;;  %v675_v21 = vsel %vm659_vm8, -0.1, %v1700_v45  ;;  %v676_v23 = vsel %vm660_vm9, -0.1, %v1700_v45  ;;  %vm661_vm10 = vcmp.gt.f32.partialorder %v2074_v20, 0.0  ;;  %vm662_vm11 = vcmp.gt.f32.partialorder %v2082_v22, 0.0 }
  0x77   : > { %1254 = vmatpush3.msra.mxu0 %v342_v26  ;;  %1337 = vmatpush3.msra.mxu1 %v342_v26  ;;  %v677_v25 = vsel %vm661_vm10, -0.1, %v1700_v45  ;;  %v2098_v26 = vld [vmem:[%s1964_s2 + $0x68] sm:$0xff]  ;;  %vm663_vm12 = vcmp.gt.f32.partialorder %v2090_v24, 0.0  ;;  %s2314_s5 = scalar_lea.vmem [#allocation7], %s1219_s29 }
  0x78   : > { %1255 = vmatprep.subr.mxu0 %v357_v27  ;;  %1322 = vmatprep.subr.mxu1 %v357_v27  ;;  %v678_v27 = vsel %vm662_vm11, -0.1, %v1700_v45  ;;  %vm664_vm13 = vcmp.gt.f32.partialorder %v2098_v26, 0.0 }
  0x79   : > { %1256 = vmatpush3.msra.mxu0 %v341_v28  ;;  %1338 = vmatpush3.msra.mxu1 %v341_v28  ;;  %v2106_v28 = vld [vmem:[%s1964_s2 + $0x70] sm:$0xff] }
  0x7a   : > { %1257 = vmatprep.subr.mxu0 %v356_v29  ;;  %1323 = vmatprep.subr.mxu1 %v356_v29  ;;  %2586 = vst [vmem:[#allocation17_spill] sm:$0xff] %v2106_v28  ;;  %v679_v29 = vsel %vm663_vm12, -0.1, %v1700_v45  ;;  %vm2561_vm14 = vcmp.gt.f32.partialorder %v2106_v28, 0.0 }
  0x7b   : > { %1258 = vmatpush3.msra.mxu0 %v340_v30  ;;  %1339 = vmatpush3.msra.mxu1 %v340_v30  ;;  %v2114_v30 = vld [vmem:[%s1964_s2 + $0x78] sm:$0xff] }
  0x7c   : > { %1259 = vmatprep.subr.mxu0 %v355_v31  ;;  %1324 = vmatprep.subr.mxu1 %v355_v31  ;;  %v680_v31 = vsel %vm664_vm13, -0.1, %v1700_v45  ;;  %vm666_vm15 = vcmp.gt.f32.partialorder %v2114_v30, 0.0 }
  0x7d   : > { %535 = vperm.xlu0 %1482, %v1969_v32   ;;  %1260 = vmatpush3.msra.mxu0 %v339_v33 }
  0x7e   : > { %1340 = vmatpush3.msra.mxu1 %v339_v33  ;;  %435 = vmatprep.mubr.f32.mxu0 %v308_v34  ;;  %v681_v33 = vsel %vm2561_vm14, -0.1, %v1700_v45  ;;  %v682_v34 = vsel %vm666_vm15, -0.1, %v1700_v45 }
  0x7f   : > { %475 = vmatprep.mubr.f32.mxu1 %v324_v35  ;;  %436 = vmatmul.mubr.f32.vlgmr.msra.gmra.mxu0 %v307_v36 }
  0x80   : > { %476 = vmatmul.mubr.f32.vlgmr.msra.gmra.mxu1 %v323_v37  ;;  %545 = vperm.xlu1 %1483, %v1978_v38  }
  0x81   : > { %540 = vperm.xlu0 %1482, %v1981_v39   ;;  %440 = vmatprep.mubr.f32.mxu0 %v310_v40 }
  0x82   : > { %480 = vmatprep.mubr.f32.mxu1 %v326_v41 }
  0x83   : > { %441 = vmatmul.mubr.f32.gmra.mxu0 %v309_v42 }
  0x84   : > { %481 = vmatmul.mubr.f32.gmra.mxu1 %v325_v43  ;;  %550 = vperm.xlu1 %1483, %v1991_v44  }
  0x85   : > { %685 = vperm.xlu0 %1482, %v667_v46   ;;  %445 = vmatprep.mubr.f32.mxu0 %v312_v47 }
  0x86   : > { %485 = vmatprep.mubr.f32.mxu1 %v328_v48 }
  0x87   : > { %446 = vmatmul.mubr.f32.gmra.mxu0 %v311_v49 }
  0x88   : > { %486 = vmatmul.mubr.f32.gmra.mxu1 %v327_v50  ;;  %690 = vperm.xlu1 %1483, %v668_v51  }
  0x89   : > { %555 = vperm.xlu0 %1482, %v2007_v52   ;;  %450 = vmatprep.mubr.f32.mxu0 %v314_v53 }
  0x8a   : > { %490 = vmatprep.mubr.f32.mxu1 %v330_v54 }
  0x8b   : > { %451 = vmatmul.mubr.f32.gmra.mxu0 %v313_v55 }
  0x8c   : > { %491 = vmatmul.mubr.f32.gmra.mxu1 %v329_v56  ;;  %695 = vperm.xlu1 %1483, %v669_v57  }
  0x8d   : > { %560 = vperm.xlu0 %1482, %v2018_v58   ;;  %455 = vmatprep.mubr.f32.mxu0 %v316_v59  ;;  %v2555_v59 = vlaneseq }
  0x8e   : > { %495 = vmatprep.mubr.f32.mxu1 %v332_v60 }
  0x8f   : > { %456 = vmatmul.mubr.f32.gmra.mxu0 %v315_v61 }
  0x90   : > { %496 = vmatmul.mubr.f32.gmra.mxu1 %v331_v62  ;;  %700 = vperm.xlu1 %1483, %v670_v63  }
  0x91   : > { %565 = vperm.xlu0 %1482, %v2030_v0   ;;  %460 = vmatprep.mubr.f32.mxu0 %v318_v1  ;;  %v2156_v1 = vshrl.u32 %v2555_v59, 7 }
  0x92   : > { %500 = vmatprep.mubr.f32.mxu1 %v334_v2 }
  0x93   : > { %461 = vmatmul.mubr.f32.gmra.mxu0 %v317_v3 }
  0x94   : > { %501 = vmatmul.mubr.f32.gmra.mxu1 %v333_v4  ;;  %705 = vperm.xlu1 %1483, %v671_v5  }
  0x95   : > { %570 = vperm.xlu0 %1482, %v2042_v6   ;;  %465 = vmatprep.mubr.f32.mxu0 %v320_v7 }
  0x96   : > { %505 = vmatprep.mubr.f32.mxu1 %v336_v8 }
  0x97   : > { %466 = vmatmul.mubr.f32.gmra.mxu0 %v319_v9 }
  0x98   : > { %506 = vmatmul.mubr.f32.gmra.mxu1 %v335_v10  ;;  %710 = vperm.xlu1 %1483, %v672_v11   ;;  %v2556_v10 = vsub.s32 0, %v2156_v1 }
  0x99   : > { %575 = vperm.xlu0 %1482, %v2054_v12   ;;  %470 = vmatprep.mubr.f32.mxu0 %v322_v13  ;;  %v2164_v13 = vld [vmem:[%s306_s12] sm:$0x1] }
  0x9a   : > { %510 = vmatprep.mubr.f32.mxu1 %v338_v14  ;;  %vm795_vm14 = vcmp.gt.f32.partialorder %v2164_v13, 0.0 }
  0x9b   : > { %471 = vmatmul.mubr.f32.gmra.mxu0 %v321_v15 }
  0x9c   : > { %511 = vmatmul.mubr.f32.gmra.mxu1 %v337_v16  ;;  %715 = vperm.xlu1 %1483, %v673_v17  }
  0x9d   : > { %580 = vperm.xlu0 %1482, %v2066_v18  }
  0xa0   : > { %720 = vperm.xlu1 %1483, %v674_v19  }
  0xa1   : > { %585 = vperm.xlu0 %1482, %v2074_v20  }
  0xa4   : > { %725 = vperm.xlu1 %1483, %v675_v21  }
  0xa5   : > { %590 = vperm.xlu0 %1482, %v2082_v22  }
  0xa8   : > { %730 = vperm.xlu1 %1483, %v676_v23  }
  0xa9   : > { %595 = vperm.xlu0 %1482, %v2090_v24  }
  0xac   : > { %735 = vperm.xlu1 %1483, %v677_v25  }
  0xad   : > { %600 = vperm.xlu0 %1482, %v2098_v26  }
  0xb0   : > { %740 = vperm.xlu1 %1483, %v678_v27   ;;  %v2173_v27 = vrot.slane %v2164_v13, %v2556_v10 }
  0xb1   : > { %605 = vperm.xlu0 %1482, %v2106_v28  }
  0xb4   : > { %745 = vperm.xlu1 %1483, %v679_v29  }
  0xb5   : > { %610 = vperm.xlu0 %1482, %v2114_v30  }
  0xb8   : > { %750 = vperm.xlu1 %1483, %v680_v31  }
  0xb9   : > { %755 = vperm.xlu0 %1482, %v681_v33  }
  0xbc   : > { %760 = vperm.xlu1 %1483, %v682_v34  }
  0xf8   : > { %v536_v35 = vpop.permute.xlu0 %535 }
  0xfb   : > { %v546_v36 = vpop.permute.xlu1 %545 }
  0xfc   : > { %v541_v37 = vpop.permute.xlu0 %540 }
  0xff   : > { %v551_v40 = vpop.permute.xlu1 %550 }
 0x100   : > { %v2129_v41 = vpop.permute.xlu0 %685 }
 0x103   : > { %v2131_v42 = vpop.permute.xlu1 %690 }
 0x104   : > { %v556_v43 = vpop.permute.xlu0 %555 }
 0x107   : > { %v2133_v46 = vpop.permute.xlu1 %695 }
 0x108   : > { %v2135_v47 = vpop.permute.xlu0 %560 }
 0x10b   : > { %v2137_v48 = vpop.permute.xlu1 %700 }
 0x10c   : > { %v2139_v49 = vpop.permute.xlu0 %565 }
 0x10f   : > { %v2141_v45 = vpop.permute.xlu1 %705 }
 0x110   : > { %v2143_v50 = vpop.permute.xlu0 %570 }
 0x113   : > { %v2145_v51 = vpop.permute.xlu1 %710 }
 0x114   : > { %v2147_v53 = vpop.permute.xlu0 %575 }
 0x117   : > { %v2150_v56 = vpop.permute.xlu1 %715 }
 0x118   : > { %v2153_v63 = vpop.permute.xlu0 %580 }
 0x11b   : > { %v2158_v4 = vpop.permute.xlu1 %720 }
 0x11c   : > { %v2166_v16 = vpop.permute.xlu0 %585 }
 0x11f   : > { %v2168_v23 = vpop.permute.xlu1 %725 }
 0x123   : > { %v2184_v59 = vpop.permute.xlu1 %730 }
 0x13f   : > { %v1261_v54 = vpop.f32.mrf.mxu0 }
 0x140   : > { %v1285_v55 = vpop.f32.mrf.mxu1 }
 0x141   : > { %v1262_v57 = vpop.f32.mrf.mxu0 }
 0x142   : > { %v1286_v60 = vpop.f32.mrf.mxu1  ;;  %v1263_v9 = vadd.f32 %v1262_v57, %v1261_v54 }
 0x143   : > { %v1264_v61 = vpop.f32.mrf.mxu0  ;;  %v1287_v28 = vadd.f32 %v1286_v60, %v1285_v55 }
 0x144   : > { %v1288_v62 = vpop.f32.mrf.mxu1  ;;  %v613_v25 = vmul.f32 %v1263_v9, %v536_v35 }
 0x145   : > { %v1265_v2 = vpop.f32.mrf.mxu0 }
 0x146   : > { %v1289_v3 = vpop.f32.mrf.mxu1  ;;  %v1266_v7 = vadd.f32 %v1265_v2, %v1264_v61 }
 0x147   : > { %v1267_v5 = vpop.f32.mrf.mxu0 }
 0x148   : > { %v1291_v8 = vpop.f32.mrf.mxu1  ;;  %v614_v19 = vmul.f32 %v1266_v7, %v541_v37  ;;  %v591_v37 = vpop.permute.xlu0 %590 }
 0x149   : > { %v1268_v11 = vpop.f32.mrf.mxu0 }
 0x14a   : > { %v1269_v14 = vadd.f32 %v1268_v11, %v1267_v5  ;;  %v1292_v15 = vpop.f32.mrf.mxu1  ;;  %v2176_v57 = vmul.f32 %v2173_v27, %v614_v19  ;;  %v2179_v5 = vmul.f32 %v2173_v27, %v613_v25 }
 0x14b   : > { %v1270_v17 = vpop.f32.mrf.mxu0 }
 0x14c   : > { %v1294_v21 = vpop.f32.mrf.mxu1  ;;  %v615_v31 = vmul.f32 %v1269_v14, %v546_v36  ;;  %2589 = vst [vmem:[#allocation18_spill] sm:$0xff] %v2176_v57  ;;  %2590 = vst [vmem:[#allocation19_spill] sm:$0xff] %v2179_v5  ;;  %v764_v14 = vsub.f32 %v2176_v57, %v2131_v42  ;;  %v763_v25 = vsub.f32 %v2179_v5, %v2129_v41  ;;  %v596_v10 = vpop.permute.xlu0 %595 }
 0x14d   : > { %v1271_v29 = vpop.f32.mrf.mxu0 }
 0x14e   : > { %v1272_v33 = vadd.f32 %v1271_v29, %v1270_v17  ;;  %v1295_v34 = vpop.f32.mrf.mxu1  ;;  %v2182_v7 = vmul.f32 %v2173_v27, %v615_v31  ;;  %v2198_v57 = vmax.f32 %v764_v14, 0.0  ;;  %v2205_v5 = vmax.f32 %v763_v25, 0.0 }
 0x14f   : > { %v1273_v54 = vpop.f32.mrf.mxu0  ;;  %v1293_v14 = vadd.f32 %v1292_v15, %v1291_v8 }
 0x150   : > { %v616_v61 = vmul.f32 %v1272_v33, %v551_v40  ;;  %v1297_v2 = vpop.f32.mrf.mxu1  ;;  %2591 = vst [vmem:[#allocation20_spill] sm:$0xff] %v2182_v7  ;;  %v765_v31 = vsub.f32 %v2182_v7, %v2133_v46  ;;  %v1290_v46 = vadd.f32 %v1289_v3, %v1288_v62  ;;  %v797_v25 = vadd.f32 %v2198_v57, %v2205_v5 }
 0x151   : > { %v1274_v35 = vpop.f32.mrf.mxu0 }
 0x152   : > { %v1275_v9 = vadd.f32 %v1274_v35, %v1273_v54  ;;  %v1298_v11 = vpop.f32.mrf.mxu1  ;;  %v2189_v17 = vmul.f32 %v2173_v27, %v616_v61  ;;  %v2207_v7 = vmax.f32 %v765_v31, 0.0  ;;  %v622_v31 = vmul.f32 %v1290_v46, %v2153_v63 }
 0x153   : > { %v1276_v36 = vpop.f32.mrf.mxu0 }
 0x154   : > { %v617_v40 = vmul.f32 %v1275_v9, %v556_v43  ;;  %v1300_v19 = vpop.f32.mrf.mxu1  ;;  %v766_v43 = vsub.f32 %v2189_v17, %v2137_v48  ;;  %v2203_v9 = vpop.permute.xlu1 %735  ;;  %v621_v48 = vmul.f32 %v1287_v28, %v2147_v53  ;;  %v798_v28 = vadd.f32 %v797_v25, %v2207_v7 }
 0x155   : > { %v1277_v29 = vpop.f32.mrf.mxu0 }
 0x156   : > { %v2196_v33 = vmul.f32 %v2173_v27, %v617_v40  ;;  %v1278_v54 = vadd.f32 %v1277_v29, %v1276_v36  ;;  %v1301_v35 = vpop.f32.mrf.mxu1 }
 0x157   : > { %v1279_v42 = vpop.f32.mrf.mxu0  ;;  %v1302_v25 = vadd.f32 %v1301_v35, %v1300_v19 }
 0x158   : > { %v618_v61 = vmul.f32 %v1278_v54, %v2135_v47  ;;  %v1303_v41 = vpop.f32.mrf.mxu1  ;;  %v767_v55 = vsub.f32 %v2196_v33, %v2141_v45  ;;  %v2217_v54 = vmax.f32 %v766_v43, 0.0  ;;  %v601_v45 = vpop.permute.xlu0 %600 }
 0x159   : > { %v1280_v40 = vpop.f32.mrf.mxu0  ;;  %v741_v43 = vpop.permute.xlu1 %740 }
 0x15a   : > { %v2212_v60 = vmul.f32 %v2173_v27, %v618_v61  ;;  %v1281_v36 = vadd.f32 %v1280_v40, %v1279_v42  ;;  %v1304_v47 = vpop.f32.mrf.mxu1  ;;  %v1296_v61 = vadd.f32 %v1295_v34, %v1294_v21  ;;  %v2224_v53 = vmax.f32 %v767_v55, 0.0 }
 0x15b   : > { %v1282_v29 = vpop.f32.mrf.mxu0  ;;  %v2230_v40 = vmul.f32 %v2173_v27, %v621_v48  ;;  %v799_v63 = vadd.f32 %v798_v28, %v2217_v54  ;;  %v2240_v55 = vmul.f32 %v2173_v27, %v622_v31 }
 0x15c   : > { %v768_v62 = vsub.f32 %v2212_v60, %v2145_v51  ;;  %v619_v3 = vmul.f32 %v1281_v36, %v2139_v49  ;;  %v623_v51 = vmul.f32 %v1293_v14, %v2166_v16  ;;  %v1299_v49 = vadd.f32 %v1298_v11, %v1297_v2  ;;  %v1306_v36 = vpop.f32.mrf.mxu1  ;;  %v606_v2 = vpop.permute.xlu0 %605 }
 0x15d   : > { %v1283_v42 = vpop.f32.mrf.mxu0  ;;  %v800_v48 = vadd.f32 %v799_v63, %v2224_v53  ;;  %v771_v11 = vsub.f32 %v2230_v40, %v2168_v23  ;;  %v746_v35 = vpop.permute.xlu1 %745  ;;  %v772_v31 = vsub.f32 %v2240_v55, %v2184_v59 }
 0x15e   : > { %v2227_v8 = vmul.f32 %v2173_v27, %v619_v3  ;;  %v1284_v15 = vadd.f32 %v1283_v42, %v1282_v29  ;;  %v2234_v21 = vmax.f32 %v768_v62, 0.0  ;;  %v624_v29 = vmul.f32 %v1296_v61, %v591_v37 }
 0x15f   : > { %v625_v14 = vmul.f32 %v1299_v49, %v596_v10  ;;  %v1305_v37 = vadd.f32 %v1304_v47, %v1303_v41  ;;  %v626_v42 = vmul.f32 %v1302_v25, %v601_v45  ;;  %v2264_v10 = vmax.f32 %v771_v11, 0.0 }
 0x160   : > { %v769_v34 = vsub.f32 %v2227_v8, %v2150_v56  ;;  %v620_v46 = vmul.f32 %v1284_v15, %v2143_v50  ;;  %v2251_v56 = vmul.f32 %v2173_v27, %v623_v51  ;;  %v1307_v50 = vpop.f32.mrf.mxu1  ;;  %v801_v62 = vadd.f32 %v800_v48, %v2234_v21  ;;  %v611_v51 = vpop.permute.xlu0 %610 }
 0x161   : > { %v2259_v61 = vmul.f32 %v2173_v27, %v624_v29  ;;  %v1308_v15 = vadd.f32 %v1307_v50, %v1306_v36  ;;  %v627_v47 = vmul.f32 %v1305_v37, %v606_v2  ;;  %v2272_v49 = vmax.f32 %v772_v31, 0.0 }
 0x162   : > { %v2243_v3 = vmax.f32 %v769_v34, 0.0  ;;  %v2246_v16 = vmul.f32 %v2173_v27, %v620_v46  ;;  %v773_v41 = vsub.f32 %v2251_v56, %v2203_v9  ;;  %v2276_v63 = vmul.f32 %v2173_v27, %v626_v42  ;;  %v751_v46 = vpop.permute.xlu1 %750 }
 0x163   : > { %v774_v45 = vsub.f32 %v2259_v61, %v741_v43  ;;  %v628_v34 = vmul.f32 %v1308_v15, %v611_v51  ;;  %v2283_v48 = vmul.f32 %v2173_v27, %v627_v47 }
 0x164   : > { %v770_v19 = vsub.f32 %v2246_v16, %v2158_v4  ;;  %v802_v23 = vadd.f32 %v801_v62, %v2243_v3  ;;  %v2269_v4 = vmul.f32 %v2173_v27, %v625_v14  ;;  %v2279_v29 = vmax.f32 %v773_v41, 0.0  ;;  %v756_v14 = vpop.permute.xlu0 %755 }
 0x165   : > { %v2286_v2 = vmax.f32 %v774_v45, 0.0  ;;  %v776_v43 = vsub.f32 %v2276_v63, %v751_v46  ;;  %v2291_v50 = vmul.f32 %v2173_v27, %v628_v34  ;;  %v777_v37 = vsub.f32 %v2283_v48, %v756_v14 }
 0x166   : > { %v2262_v28 = vmax.f32 %v770_v19, 0.0  ;;  %v775_v9 = vsub.f32 %v2269_v4, %v746_v35  ;;  %v761_v35 = vpop.permute.xlu1 %760  ;;  %v2592_v14 = vsub.s32 0, %v2156_v1 }
 0x167   : > { %v2297_v31 = vmax.f32 %v776_v43, 0.0  ;;  %v778_v42 = vsub.f32 %v2291_v50, %v761_v35  ;;  %v2301_v15 = vmax.f32 %v777_v37, 0.0 }
 0x168   : > { %v803_v59 = vadd.f32 %v802_v23, %v2262_v28  ;;  %v2293_v62 = vmax.f32 %v775_v9, 0.0  ;;  %v1701_v9 = vmov 0.0  }
 0x169   : > { %v2304_v41 = vmax.f32 %v778_v42, 0.0 }
 0x16a   : > { %v804_v36 = vadd.f32 %v803_v59, %v2264_v10 }
 0x16c   : > { %v805_v25 = vadd.f32 %v804_v36, %v2272_v49 }
 0x16e   : > { %v806_v11 = vadd.f32 %v805_v25, %v2279_v29  ;;  %v796_v25 = vsel %vm795_vm14, 0.5, %v1701_v9 }
 0x170   : > { %v807_v19 = vadd.f32 %v806_v11, %v2286_v2 }
 0x172   : > { %v808_v23 = vadd.f32 %v807_v19, %v2293_v62 }
 0x174   : > { %v809_v27 = vadd.f32 %v808_v23, %v2297_v31 }
 0x176   : > { %v810_v47 = vadd.f32 %v809_v27, %v2301_v15 }
 0x178   : > { %v811_v59 = vadd.f32 %v810_v47, %v2304_v41 }
 0x17a   : > { %v812_v51 = vrot.slane %v811_v59, 4 }
 0x17c   : > { %v813_v45 = vadd.f32 %v812_v51, %v811_v59 }
 0x17e   : > { %v814_v36 = vrot.slane %v813_v45, 2 }
 0x180   : > { %v815_v34 = vadd.f32 %v814_v36, %v813_v45 }
 0x182   : > { %v816_v46 = vrot.slane %v815_v34, 1 }
 0x184   : > { %v817_v43 = vadd.f32 %v816_v46, %v815_v34 }
 0x186   : > { %v818_v11 = vmul.f32 %v817_v43, %v796_v25  ;;  %827 = sbr.rel (%p1222_p11) target bundleno = 573 (0x23d), region = 48 }
 0x188   : > { %v822_v37 = vrot.slane %v818_v11, %v2592_v14 }
 0x18a   : > { %823 = vst [vmem:[%s2314_s5] sm:$0xff] %v822_v37 }
 0x18b   : > { %v1702_v13 = vmov 0   ;;  %v2593_v47 = vld [vmem:[#allocation17_spill] sm:$0xff]  ;;  %v2595_v20 = vld [vmem:[#allocation20_spill] sm:$0xff]  ;;  %v2355_v26 = vmul.f32 0.5, %v2207_v7  ;;  %v2596_v45 = vld [vmem:[#allocation19_spill] sm:$0xff]  ;;  %v962_v36 = vsub.f32 1.0, %v2189_v17  ;;  %v2598_v9 = vlaneseq }
 0x18c   : > { %1485 = vset.pattern.permute.xlu1 %v1702_v13  ;;  %1484 = vset.pattern.permute.xlu0 %v1702_v13  ;;  %v865_v19 = vsel %vm653_vm2, 1, %v1702_v13  ;;  %v863_v35 = vsel %vm651_vm0, 1, %v1702_v13  ;;  %v866_v42 = vsel %vm654_vm3, 1, %v1702_v13  ;;  %v864_v23 = vsel %vm652_vm1, 1, %v1702_v13  ;;  %v2597_v34 = vld [vmem:[#allocation18_spill] sm:$0xff] }
 0x18d   : > { %886 = vperm.xlu1 %1485, %v865_v19   ;;  %880 = vperm.xlu0 %1484, %v863_v35   ;;  %v868_v27 = vsel %vm656_vm5, 1, %v1702_v13  ;;  %v867_v38 = vsel %vm655_vm4, 1, %v1702_v13  ;;  %v870_v32 = vsel %vm658_vm7, 1, %v1702_v13  ;;  %v869_v44 = vsel %vm657_vm6, 1, %v1702_v13 }
 0x18e   : > { %v872_v39 = vsel %vm660_vm9, 1, %v1702_v13  ;;  %v871_v58 = vsel %vm659_vm8, 1, %v1702_v13  ;;  %v874_v52 = vsel %vm662_vm11, 1, %v1702_v13  ;;  %v873_v6 = vsel %vm661_vm10, 1, %v1702_v13 }
 0x18f   : > { %v876_v0 = vsel %vm664_vm13, 1, %v1702_v13  ;;  %v875_v18 = vsel %vm663_vm12, 1, %v1702_v13  ;;  %v878_v12 = vsel %vm666_vm15, 1, %v1702_v13  ;;  %vm2594_vm0 = vcmp.gt.f32.partialorder %v2593_v47, 0.0 }
 0x190   : > { %v877_v22 = vsel %vm2594_vm0, 1, %v1702_v13  ;;  %v961_v59 = vsub.f32 1.0, %v2595_v20  ;;  %v959_v24 = vsub.f32 1.0, %v2596_v45  ;;  %v960_v46 = vsub.f32 1.0, %v2597_v34 }
 0x191   : > { %889 = vperm.xlu1 %1485, %v866_v42   ;;  %883 = vperm.xlu0 %1484, %v864_v23   ;;  %v831_v30 = vadd.s32 16, %v2156_v1  ;;  %v2362_v25 = vand.u32 127, %v2598_v9  ;;  %v832_v43 = vadd.s32 24, %v2156_v1  ;;  %v991_v11 = vmul.f32 0.5, %v2205_v5 }
 0x192   : > { %v2352_v51 = vmul.f32 2.0, %v961_v59  ;;  %v964_v14 = vsub.f32 1.0, %v2212_v60  ;;  %v975_v37 = vmul.f32 2.0, %v959_v24  ;;  %v994_v13 = vmul.f32 0.5, %v2217_v54 }
 0x193   : > { %v963_v17 = vsub.f32 1.0, %v2196_v33  ;;  %v978_v42 = vmul.f32 2.0, %v962_v36  ;;  %v976_v23 = vmul.f32 2.0, %v960_v46  ;;  %vm849_vm1 = vcmp.eq.s32.totalorder %v831_v30, %v2362_v25 }
 0x194   : > { %v1009_v7 = vsub.f32 %v2352_v51, %v2355_v26  ;;  %vm847_vm2 = vcmp.eq.s32.totalorder %v2156_v1, %v2362_v25  ;;  %vm850_vm3 = vcmp.eq.s32.totalorder %v832_v43, %v2362_v25  ;;  %v834_v5 = vadd.s32 40, %v2156_v1 }
 0x195   : > { %895 = vperm.xlu1 %1485, %v868_v27   ;;  %892 = vperm.xlu0 %1484, %v867_v38   ;;  %v992_v27 = vmul.f32 0.5, %v2198_v57  ;;  %v830_v38 = vadd.s32 8, %v2156_v1  ;;  %v2378_v60 = vmul.f32 2.0, %v964_v14  ;;  %v2381_v33 = vmul.f32 0.5, %v2234_v21 }
 0x196   : > { %v833_v54 = vadd.s32 32, %v2156_v1  ;;  %v979_v57 = vmul.f32 2.0, %v963_v17  ;;  %vm852_vm9 = vcmp.eq.s32.totalorder %v834_v5, %v2362_v25  ;;  %v836_v21 = vadd.s32 56, %v2156_v1 }
 0x197   : > { %vm848_vm6 = vcmp.eq.s32.totalorder %v830_v38, %v2362_v25  ;;  %v968_v20 = vsub.f32 1.0, %v2240_v55  ;;  %v997_v24 = vmul.f32 0.5, %v2243_v3  ;;  %v967_v36 = vsub.f32 1.0, %v2230_v40 }
 0x198   : > { %vm851_vm12 = vcmp.eq.s32.totalorder %v833_v54, %v2362_v25  ;;  %vm854_vm0 = vcmp.eq.s32.totalorder %v836_v21, %v2362_v25  ;;  %v2419_v46 = vmul.f32 0.5, %v2272_v49  ;;  %v838_v3 = vadd.s32 72, %v2156_v1 }
 0x199   : > { %901 = vperm.xlu1 %1485, %v870_v32   ;;  %898 = vperm.xlu0 %1484, %v869_v44   ;;  %v995_v32 = vmul.f32 0.5, %v2224_v53  ;;  %v966_v44 = vsub.f32 1.0, %v2246_v16  ;;  %v965_v53 = vsub.f32 1.0, %v2227_v8  ;;  %v835_v8 = vadd.s32 48, %v2156_v1 }
 0x19a   : > { %v984_v9 = vmul.f32 2.0, %v968_v20  ;;  %v837_v49 = vadd.s32 64, %v2156_v1  ;;  %v840_v38 = vadd.s32 88, %v2156_v1  ;;  %v839_v54 = vadd.s32 80, %v2156_v1 }
 0x19b   : > { %v1011_v47 = vsub.f32 %v979_v57, %v995_v32  ;;  %v981_v34 = vmul.f32 2.0, %v965_v53  ;;  %v971_v32 = vsub.f32 1.0, %v2269_v4  ;;  %v1004_v4 = vmul.f32 0.5, %v2297_v31 }
 0x19c   : > { %v841_v16 = vadd.s32 96, %v2156_v1 }
 0x19d   : > { %907 = vperm.xlu1 %1485, %v872_v39   ;;  %904 = vperm.xlu0 %1484, %v871_v58   ;;  %v1007_v39 = vsub.f32 %v975_v37, %v991_v11  ;;  %v1010_v58 = vsub.f32 %v978_v42, %v994_v13  ;;  %v999_v37 = vmul.f32 0.5, %v2264_v10  ;;  %v1013_v17 = vsub.f32 %v981_v34, %v997_v24 }
 0x19e   : > { %v969_v42 = vsub.f32 1.0, %v2251_v56  ;;  %v1016_v10 = vsub.f32 %v984_v9, %v2419_v46 }
 0x1a1   : > { %913 = vperm.xlu1 %1485, %v874_v52   ;;  %910 = vperm.xlu0 %1484, %v873_v6   ;;  %v1008_v6 = vsub.f32 %v976_v23, %v992_v27  ;;  %v1002_v27 = vmul.f32 0.5, %v2286_v2  ;;  %v985_v2 = vmul.f32 2.0, %v969_v42 }
 0x1a5   : > { %919 = vperm.xlu1 %1485, %v876_v0   ;;  %916 = vperm.xlu0 %1484, %v875_v18   ;;  %v1012_v18 = vsub.f32 %v2378_v60, %v2381_v33 }
 0x1a9   : > { %925 = vperm.xlu1 %1485, %v878_v12   ;;  %922 = vperm.xlu0 %1484, %v877_v22   ;;  %v2404_v12 = vmul.f32 0.5, %v2262_v28  ;;  %v2406_v22 = vmul.f32 2.0, %v966_v44 }
 0x1ab   : > { %v1014_v40 = vsub.f32 %v2406_v22, %v2404_v12  ;;  %v1003_v12 = vmul.f32 0.5, %v2293_v62  ;;  %v973_v22 = vsub.f32 1.0, %v2283_v48  ;;  %v843_v62 = vadd.s32 112, %v2156_v1 }
 0x1ad   : > { %v989_v34 = vmul.f32 2.0, %v973_v22 }
 0x208   : > { %v887_v19 = vpop.permute.xlu1 %886  ;;  %v881_v35 = vpop.permute.xlu0 %880 }
 0x209   : > { %vm927_vm4 = vcmp.eq.s32.totalorder %v881_v35, 1  ;;  %vm929_vm5 = vcmp.eq.s32.totalorder %v887_v19, 1  ;;  %v970_v19 = vsub.f32 1.0, %v2259_v61 }
 0x20a   : > { %vm943_vm7 = vmand %vm847_vm2, %vm927_vm4 }
 0x20b   : > { %vm2396_vm10 = vmand %vm849_vm1, %vm929_vm5  ;;  %v1023_v59 = vsel %vm943_vm7, %v1007_v39, 0.0  ;;  %vm856_vm7 = vcmp.eq.s32.totalorder %v838_v3, %v2362_v25  ;;  %v986_v57 = vmul.f32 2.0, %v970_v19  ;;  %v1001_v39 = vmul.f32 0.5, %v2279_v29 }
 0x20c   : > { %v890_v52 = vpop.permute.xlu1 %889  ;;  %v884_v0 = vpop.permute.xlu0 %883  ;;  %v1025_v55 = vsel %vm2396_vm10, %v1009_v7, 0.0  ;;  %v983_v7 = vmul.f32 2.0, %v967_v36  ;;  %v844_v36 = vadd.s32 120, %v2156_v1 }
 0x20d   : > { %vm928_vm8 = vcmp.eq.s32.totalorder %v884_v0, 1  ;;  %vm930_vm11 = vcmp.eq.s32.totalorder %v890_v52, 1  ;;  %v972_v52 = vsub.f32 1.0, %v2276_v63  ;;  %v1018_v20 = vsub.f32 %v986_v57, %v1002_v27 }
 0x20e   : > { %vm944_vm13 = vmand %vm848_vm6, %vm928_vm8  ;;  %v1015_v33 = vsub.f32 %v983_v7, %v999_v37 }
 0x20f   : > { %v1024_v51 = vsel %vm944_vm13, %v1008_v6, 0.0  ;;  %vm946_vm14 = vmand %vm850_vm3, %vm930_vm11  ;;  %vm853_vm3 = vcmp.eq.s32.totalorder %v835_v8, %v2362_v25  ;;  %v842_v6 = vadd.s32 104, %v2156_v1 }
 0x210   : > { %v896_v26 = vpop.permute.xlu1 %895  ;;  %v893_v45 = vpop.permute.xlu0 %892  ;;  %v1040_v28 = vadd.f32 %v1024_v51, %v1023_v59  ;;  %v1026_v43 = vsel %vm946_vm14, %v1010_v58, 0.0  ;;  %vm858_vm14 = vcmp.eq.s32.totalorder %v840_v38, %v2362_v25  ;;  %v988_v59 = vmul.f32 2.0, %v972_v52 }
 0x211   : > { %vm931_vm15 = vcmp.eq.s32.totalorder %v893_v45, 1  ;;  %vm932_vm1 = vcmp.eq.s32.totalorder %v896_v26, 1  ;;  %v974_v45 = vsub.f32 1.0, %v2291_v50 }
 0x212   : > { %v1041_v30 = vadd.f32 %v1040_v28, %v1025_v55  ;;  %vm947_vm2 = vmand %vm851_vm12, %vm931_vm15  ;;  %vm857_vm15 = vcmp.eq.s32.totalorder %v839_v54, %v2362_v25  ;;  %v1005_v55 = vmul.f32 0.5, %v2301_v15  ;;  %v1020_v3 = vsub.f32 %v988_v59, %v1004_v4 }
 0x213   : > { %vm948_vm4 = vmand %vm852_vm9, %vm932_vm1  ;;  %v1027_v35 = vsel %vm947_vm2, %v1011_v47, 0.0  ;;  %vm855_vm9 = vcmp.eq.s32.totalorder %v837_v49, %v2362_v25  ;;  %v1017_v47 = vsub.f32 %v985_v2, %v1001_v39  ;;  %v990_v50 = vmul.f32 2.0, %v974_v45 }
 0x214   : > { %v902_v11 = vpop.permute.xlu1 %901  ;;  %v899_v14 = vpop.permute.xlu0 %898  ;;  %v1042_v13 = vadd.f32 %v1041_v30, %v1026_v43  ;;  %v1028_v5 = vsel %vm948_vm4, %v1012_v18, 0.0  ;;  %v987_v18 = vmul.f32 2.0, %v971_v32  ;;  %vm860_vm4 = vcmp.eq.s32.totalorder %v842_v6, %v2362_v25 }
 0x215   : > { %vm933_vm5 = vcmp.eq.s32.totalorder %v899_v14, 1  ;;  %vm934_vm6 = vcmp.eq.s32.totalorder %v902_v11, 1  ;;  %v1021_v15 = vsub.f32 %v989_v34, %v1005_v55 }
 0x216   : > { %v1043_v23 = vadd.f32 %v1042_v13, %v1027_v35  ;;  %vm949_vm8 = vmand %vm853_vm3, %vm933_vm5  ;;  %vm859_vm5 = vcmp.eq.s32.totalorder %v841_v16, %v2362_v25  ;;  %v1019_v48 = vsub.f32 %v987_v18, %v1003_v12 }
 0x217   : > { %vm950_vm10 = vmand %vm854_vm0, %vm934_vm6  ;;  %v1029_v44 = vsel %vm949_vm8, %v1013_v17, 0.0 }
 0x218   : > { %v908_v60 = vpop.permute.xlu1 %907  ;;  %v905_v61 = vpop.permute.xlu0 %904  ;;  %v1044_v56 = vadd.f32 %v1043_v23, %v1028_v5  ;;  %v1030_v0 = vsel %vm950_vm10, %v1014_v40, 0.0  ;;  %v1006_v40 = vmul.f32 0.5, %v2304_v41  ;;  %vm861_vm10 = vcmp.eq.s32.totalorder %v843_v62, %v2362_v25 }
 0x219   : > { %vm935_vm11 = vcmp.eq.s32.totalorder %v905_v61, 1  ;;  %vm936_vm12 = vcmp.eq.s32.totalorder %v908_v60, 1 }
 0x21a   : > { %v1045_v58 = vadd.f32 %v1044_v56, %v1029_v44  ;;  %vm951_vm13 = vmand %vm855_vm9, %vm935_vm11  ;;  %v1022_v41 = vsub.f32 %v990_v50, %v1006_v40 }
 0x21b   : > { %vm952_vm0 = vmand %vm856_vm7, %vm936_vm12  ;;  %v1031_v63 = vsel %vm951_vm13, %v1015_v33, 0.0  ;;  %vm862_vm13 = vcmp.eq.s32.totalorder %v844_v36, %v2362_v25  ;;  %v1039_v25 = vld [vmem:[%s2314_s5] sm:$0xff] }
 0x21c   : > { %v914_v21 = vpop.permute.xlu1 %913  ;;  %v911_v53 = vpop.permute.xlu0 %910  ;;  %v1046_v29 = vadd.f32 %v1045_v58, %v1030_v0  ;;  %v1032_v31 = vsel %vm952_vm0, %v1016_v10, 0.0 }
 0x21d   : > { %vm937_vm1 = vcmp.eq.s32.totalorder %v911_v53, 1  ;;  %vm938_vm2 = vcmp.eq.s32.totalorder %v914_v21, 1 }
 0x21e   : > { %v1047_v8 = vadd.f32 %v1046_v29, %v1031_v63  ;;  %vm953_vm3 = vmand %vm857_vm15, %vm937_vm1 }
 0x21f   : > { %vm954_vm6 = vmand %vm858_vm14, %vm938_vm2  ;;  %v1033_v28 = vsel %vm953_vm3, %v1017_v47, 0.0 }
 0x220   : > { %v920_v51 = vpop.permute.xlu1 %919  ;;  %v917_v26 = vpop.permute.xlu0 %916  ;;  %v1048_v24 = vadd.f32 %v1047_v8, %v1032_v31  ;;  %v1034_v30 = vsel %vm954_vm6, %v1018_v20, 0.0 }
 0x221   : > { %vm939_vm7 = vcmp.eq.s32.totalorder %v917_v26, 1  ;;  %vm940_vm8 = vcmp.eq.s32.totalorder %v920_v51, 1 }
 0x222   : > { %v1049_v46 = vadd.f32 %v1048_v24, %v1033_v28  ;;  %vm955_vm9 = vmand %vm859_vm5, %vm939_vm7 }
 0x223   : > { %vm956_vm11 = vmand %vm860_vm4, %vm940_vm8  ;;  %v1035_v11 = vsel %vm955_vm9, %v1019_v48, 0.0 }
 0x224   : > { %v926_v9 = vpop.permute.xlu1 %925  ;;  %v923_v43 = vpop.permute.xlu0 %922  ;;  %v1050_v1 = vadd.f32 %v1049_v46, %v1034_v30  ;;  %v1036_v7 = vsel %vm956_vm11, %v1020_v3, 0.0 }
 0x225   : > { %vm941_vm12 = vcmp.eq.s32.totalorder %v923_v43, 1  ;;  %vm942_vm14 = vcmp.eq.s32.totalorder %v926_v9, 1 }
 0x226   : > { %v1051_v14 = vadd.f32 %v1050_v1, %v1035_v11  ;;  %vm957_vm15 = vmand %vm861_vm10, %vm941_vm12 }
 0x227   : > { %vm958_vm0 = vmand %vm862_vm13, %vm942_vm14  ;;  %v1037_v49 = vsel %vm957_vm15, %v1021_v15, 0.0 }
 0x228   : > { %v1052_v37 = vadd.f32 %v1051_v14, %v1036_v7  ;;  %v1038_v17 = vsel %vm958_vm0, %v1022_v41, 0.0 }
 0x22a   : > { %v1053_v13 = vadd.f32 %v1052_v37, %v1037_v49 }
 0x22c   : > { %v1054_v19 = vadd.f32 %v1053_v13, %v1038_v17 }
 0x22e   : > { %v1055_v35 = vrot.slane %v1054_v19, 4 }
 0x230   : > { %v1056_v42 = vadd.f32 %v1055_v35, %v1054_v19 }
 0x232   : > { %v1057_v23 = vrot.slane %v1056_v42, 2 }
 0x234   : > { %v1058_v10 = vadd.f32 %v1057_v23, %v1056_v42 }
 0x236   : > { %v1059_v27 = vrot.slane %v1058_v10, 1 }
 0x238   : > { %v1060_v38 = vadd.f32 %v1059_v27, %v1058_v10 }
 0x23a   : > { %v1061_v5 = vadd.f32 %v1060_v38, %v1039_v25 }
 0x23c   : > { %1062 = vst [vmem:[%s2314_s5] sm:$0xff] %v1061_v5 }
 0x23d PF: > { %s2601_s21 = sld [smem:[#allocation11_spill]]  ;;  %s1341_s8 = smul.u32 5, %s1678_s25 }
 0x23e   : > { %s2602_s13 = sld [smem:[#allocation16_spill]]  ;;  %s1079_s4 = sshll.u32 %s2314_s5, 4  ;;  %s1080_s4 = int_to_ptr.vmem [resolvable:$true] %s1079_s4 }
 0x23f   : > { %s2603_s30 = sld [smem:[#allocation24_spill]]  ;;  %s1064_s10 = scalar_lea.sflag [#allocation4], %s294_s27 }
 0x240   : > { %s1542_s6 = scalar_lea.vmem %s1080_s4, 128  ;;  %s1703_s11 = smov [#allocation7]  }
 0x241   : > { %p1543_p8 = scmp.ne.s32.totalorder %s1080_s4, %s1542_s6  ;;  %s1546_s12 = sshll.u32 %s1703_s11, 4  ;;  %s1547_s12 = int_to_ptr.vmem [resolvable:$false] %s1546_s12 }
 0x242   : > { %s1548_s29 = scalar_lea.vmem %s1547_s12, 256  ;;  %p1549_p4 = scmp.lt.s32.totalorder %s1080_s4, %s1547_s12 }
 0x243   : > { %s1075_s18 = sadd.s32 %s2601_s21, %s1341_s8  ;;  %p1550_p5 = scmp.lt.s32.totalorder %s1548_s29, %s1542_s6 }
 0x244   : > { %s1224_s24 = sshll.u32 %s1075_s18, 7  ;;  %p2604_p9 = scmp.ne.s32.totalorder %s2602_s13, 0 }
 0x245   : > { %s1077_s14 = scalar_lea.hbm %s2603_s30, %s1224_s24  ;;  %p1551_p10 = por %p1550_p5, %p1549_p4 }
 0x246   : > { %p1544_p1 = pnand %p1543_p8, %p2604_p9 }
 0x248   : > { %p1545_p2 = pneg %p1544_p1 }
 0x24a   : > { %p1552_p12 = pnand %p1551_p10, %p1545_p2 }
 0x24c   : > { %1555 = shalt.err (!%p1552_p12)
}
 0x24d   : > { %s1556_s25 = scalar_lea.hbm %s1077_s14, 128  ;;  %s1560_s21 = scalar_lea.hbm %s2603_s30, 3200 }
 0x24e   : > { %p1557_p3 = scmp.ne.s32.totalorder %s1077_s14, %s1556_s25  ;;  %p1561_p6 = scmp.lt.s32.totalorder %s1077_s14, %s2603_s30 }
 0x24f   : > { %p1562_p7 = scmp.lt.s32.totalorder %s1560_s21, %s1556_s25 }
 0x250   : > { %p1558_p13 = pnand %p1557_p3, %p2604_p9 }
 0x251   : > { %p1563_p11 = por %p1562_p7, %p1561_p6 }
 0x252   : > { %p1559_p0 = pneg %p1558_p13 }
 0x254   : > { %p1564_p8 = pnand %p1563_p11, %p1559_p0 }
 0x256   : > { %1567 = shalt.err (!%p1564_p8)
}
 0x257   : > { %1346 = dma.vmem_to_hbm [thread:$0]  (%p2604_p9), %s1080_s4, 128, %s1077_s14, %s1064_s10  }
 0x258 PF: > { %p1360_p1 = scmp.ge.s32.totalorder %s1690_s28, 2  ;;  %s1091_s24 = sand.u32 1, %s1638_s15  }
 0x259   : > { %p2605_p2 = scmp.ne.s32.totalorder %s2583_s7, 0  ;;  %s1092_s9 = scalar_lea.sflag [#allocation4], %s1091_s24 }
 0x25b   : > { %p1356_p4 = pnand %p1360_p1, %p2605_p2 }
 0x25d   : > { %p1357_p5 = pneg %p1356_p4 }
 0x25f   : > { %1633 = dma.done.wait (%p1357_p5), %s1092_s9, 128  }
 0x260   : > { %1635 = vsyncadd (%p1357_p5), %s1092_s9, 4294967168  ;;  %s23_s28 = sadd.s32 1, %s1690_s28   ;;  %s2607_s13 = sld [smem:[#allocation15_spill]] }
 0x261   : > { %p2495_p10 = scmp.ge.s32.totalorder %s23_s28, 27   ;;  %s2608_s25 = sld [smem:[#allocation12_spill]] }
 0x262   : > { %s2609_s7 = sld [smem:[#allocation13_spill]]  ;;  %s2611_s15 = smov %s1642_s16 }
 0x263   : > { %s2610_s27 = sld [smem:[#allocation14_spill]]  ;;  %s2612_s16 = smov %s1646_s17 }
 0x264   : > { %s2613_s17 = smov %s1892_s0  ;;  %s2614_s18 = smov %s1654_s19 }
 0x265   : > { %s2615_s19 = smov %s1658_s20  ;;  %s2617_s21 = smov %s1666_s22 }
 0x266   : > { %s2616_s20 = smov %s2607_s13  ;;  %s2618_s22 = smov %s1670_s23 }
 0x267   : > { %s2619_s23 = smov %s1889_s3  ;;  %s2620_s24 = smov %s1682_s26 }
 0x268   : > { %s2621_s26 = smov %s2609_s7  ;;  %22 = sbr.rel (!%p2495_p10) target bundleno = 17 (0x11), region = 104 }
 0x26d   :  { %1097 = vsyncpa [#allocation3], 1 }
 0x26e   :  { %1099 = vsyncpa [#allocation3 + $0x1], 1 }
 0x26f   :  { %1100 = vsyncpa [#allocation6], 1 }
 0x270   :  { %1102 = vsyncpa [#allocation6 + $0x1], 1 }
 0x271   :  { %1103 = vsyncpa [#allocation4], 1 }
 0x272   :  { %1105 = vsyncpa [#allocation4 + $0x1], 1 }

</bundles_post_ra>
